<compile_context>
chip_gen: v5e
topology: v5e:2x2
jax: 0.10.0
libtpu: 0.0.40
codegen_flags: <defaults>
</compile_context>

<pallas_src>
import jax
import jax.numpy as jnp
from jax import lax
from jax.experimental import pallas as pl
from jax.experimental.pallas import tpu as pltpu

# ---- synthetic model dimensions (small, consistent with a CLIP text encoder) ----
B = 2            # batch (number of prompts)  -- fold class/prompt dim in here for real use
S = 8            # sequence length
D = 32           # transformer width
H = 4            # attention heads
DH = D // H      # head dim
L = 2            # number of residual attention blocks
MLP = 4 * D      # MLP hidden width
P = 16           # text_projection output dim
P_PAD = 128      # lane-dense padded projection width (sliced back to P outside)
EPS = 1e-5       # LayerNorm eps (PyTorch default)

BT = B           # batch-tile size (rows per grid step = BT*S); raise B / split when folded
NB = B // BT     # number of batch tiles ("parallel" grid axis -> both TCs on v7x)

QKV_PAD = 128    # fused q|k|v weight slab lane width (3*D=96 padded to 128)
VEC_W = 128      # bias / LN-parameter slab lane width
N_VEC = 10       # rows: 0 ln1_g 1 ln1_b 2 b_qkv 3 b_o 4 ln2_g 5 ln2_b 6 b_fc 7 b_pj
                 #       8 lnf_g 9 lnf_b (ln_final rides in the last layer's slab)
assert 3 * D <= QKV_PAD and MLP <= VEC_W and D <= VEC_W and B % BT == 0

_FLOPS = (L * (2 * B * S * D * QKV_PAD          # fused qkv projection
               + 2 * 2 * B * H * S * S * DH     # scores + context
               + 2 * B * S * D * D              # output projection
               + 2 * 2 * B * S * D * MLP)       # c_fc + c_proj
          + 2 * B * (BT * S) * D                # EOT selector matmul
          + 2 * B * D * P_PAD)                  # text projection
_TRANS = L * (B * H * S * S + B * S * MLP)
_BYTES = (B * S * D * 4 + S * D * 4 + S * S * 4 + B * BT * S * 4
          + L * (D * QKV_PAD + D * D + D * MLP + MLP * D) * 2
          + L * N_VEC * VEC_W * 4 + D * P_PAD * 2 + B * P_PAD * 4)


def _layernorm(x, g, b):
    mu = jnp.mean(x, axis=-1, keepdims=True)
    var = jnp.mean((x - mu) ** 2, axis=-1, keepdims=True)
    return (x - mu) * lax.rsqrt(var + EPS) * g + b


def text_encoder_kernel(prompts_ref,   # (BT, S, D) f32        (used only at l==0)
                        pos_ref,       # (S, D) f32
                        mask_ref,      # (S, S) f32             hoisted causal mask
                        sel_ref,       # (BT, BT*S) f32         EOT one-hot selector
                        wqkv_ref,      # (1, D, QKV_PAD) bf16   fused q|k|v (q pre-scaled)
                        wo_ref,        # (1, D, D) bf16
                        wfc_ref,       # (1, D, MLP) bf16
                        wpj_ref,       # (1, MLP, D) bf16
                        vec_ref,       # (1, N_VEC, VEC_W) f32  biases + LN params
                        tproj_ref,     # (D, P_PAD) bf16        (used only at l==L-1)
                        out_ref,       # (BT, P_PAD) f32
                        x_ref):        # VMEM scratch (BT*S, D) f32 -- residual stream
    l = pl.program_id(1)

    # layer 0: seed the (flat) residual stream with prompts + positional embedding
    @pl.when(l == 0)
    def _():
        x_ref[...] = (prompts_ref[...] + pos_ref[...][None, :, :]).reshape(BT * S, D)

    vec = vec_ref[0]                                  # (N_VEC, VEC_W) f32
    ln1g, ln1b = vec[0, :D], vec[1, :D]
    bqkv = vec[2]                                     # full 128-wide row (zero-padded)
    bo = vec[3, :D]
    ln2g, ln2b = vec[4, :D], vec[5, :D]
    bfc, bpj = vec[6, :MLP], vec[7, :D]

    x = x_ref[...]                                    # (BT*S, D) f32

    # ---- multi-head self-attention ----
    y = _layernorm(x, ln1g, ln1b).astype(jnp.bfloat16)
    qkv = jnp.dot(y, wqkv_ref[0], preferred_element_type=jnp.float32) + bqkv  # (BT*S, 128)
    q = qkv[:, 0 * D:1 * D]                           # 1/sqrt(DH) folded into Wq/bq
    k = qkv[:, 1 * D:2 * D]
    v = qkv[:, 2 * D:3 * D]

    def heads(t):                                     # (BT*S, D) -> (BT*H, S, DH)
        return jnp.transpose(t.reshape(BT, S, H, DH), (0, 2, 1, 3)).reshape(BT * H, S, DH)

    qh = heads(q).astype(jnp.bfloat16)
    kh = heads(k).astype(jnp.bfloat16)
    vh = heads(v).astype(jnp.bfloat16)

    s = jnp.einsum('nqd,nkd->nqk', qh, kh,
                   preferred_element_type=jnp.float32)            # (BT*H, S, S) f32
    s = s + mask_ref[...][None, :, :]                              # causal (-inf above diag)
    s = s - jnp.max(s, axis=-1, keepdims=True)
    p = jnp.exp(s)
    p = p * pl.reciprocal(jnp.sum(p, axis=-1, keepdims=True), approx=True)
    ctx = jnp.einsum('nqk,nkd->nqd', p.astype(jnp.bfloat16), vh,
                     preferred_element_type=jnp.float32)           # (BT*H, S, DH)
    ctx = jnp.transpose(ctx.reshape(BT, H, S, DH), (0, 2, 1, 3)).reshape(BT * S, D)

    attn = jnp.dot(ctx.astype(jnp.bfloat16), wo_ref[0],
                   preferred_element_type=jnp.float32) + bo
    x = x + attn                                                   # residual

    # ---- MLP sub-block: c_fc -> QuickGELU -> c_proj ----
    y = _layernorm(x, ln2g, ln2b).astype(jnp.bfloat16)
    hdn = jnp.dot(y, wfc_ref[0], preferred_element_type=jnp.float32) + bfc   # (BT*S, MLP)
    hdn = hdn * (1.0 / (1.0 + jnp.exp(-1.702 * hdn)))              # QuickGELU (f32)
    mlp = jnp.dot(hdn.astype(jnp.bfloat16), wpj_ref[0],
                  preferred_element_type=jnp.float32) + bpj
    x = x + mlp                                                    # residual

    x_ref[...] = x                                                 # carry residual stream

    # ---- last layer: ln_final, EOT pooling (one selector matmul), @ text_projection ----
    @pl.when(l == L - 1)
    def _():
        lnfg, lnfb = vec[8, :D], vec[9, :D]
        xf = _layernorm(x, lnfg, lnfb)                             # (BT*S, D) f32
        pooled = jnp.dot(sel_ref[...], xf,
                         preferred_element_type=jnp.float32)       # (BT, D)
        out_ref[...] = jnp.dot(pooled.astype(jnp.bfloat16), tproj_ref[...],
                               preferred_element_type=jnp.float32) # (BT, P_PAD)


def make_params(key):
    """'Natural' (checkpoint-like) parameter layout."""
    ks = jax.random.split(key, 6)
    init = lambda k, shape, sc: jax.random.normal(k, shape, jnp.float32) * sc
    return dict(
        pos=init(ks[0], (S, D), 0.01),
        wqkv=init(ks[1], (L, D, 3 * D), 0.02),
        bqkv=jnp.zeros((L, 3 * D), jnp.float32),
        wo=init(ks[2], (L, D, D), 0.02),
        bo=jnp.zeros((L, D), jnp.float32),
        ln1g=jnp.ones((L, D), jnp.float32),
        ln1b=jnp.zeros((L, D), jnp.float32),
        ln2g=jnp.ones((L, D), jnp.float32),
        ln2b=jnp.zeros((L, D), jnp.float32),
        wfc=init(ks[3], (L, D, MLP), 0.02),
        bfc=jnp.zeros((L, MLP), jnp.float32),
        wpj=init(ks[4], (L, MLP, D), 0.02),
        bpj=jnp.zeros((L, D), jnp.float32),
        lnfg=jnp.ones((D,), jnp.float32),
        lnfb=jnp.zeros((D,), jnp.float32),
        tproj=init(ks[5], (D, P), 0.05),
    )


def pack_params(p):
    """Pack per-tensor params into lane-friendly slabs (weights -> bf16)."""
    scale = DH ** -0.5
    # fused q|k|v weight slab, q columns pre-scaled, padded to 128 lanes
    wq = p['wqkv'][:, :, 0 * D:1 * D] * scale
    wkv = p['wqkv'][:, :, 1 * D:3 * D]
    w_qkv = jnp.concatenate([wq, wkv], axis=-1)                    # (L, D, 3D)
    w_qkv = jnp.pad(w_qkv, ((0, 0), (0, 0), (0, QKV_PAD - 3 * D))).astype(jnp.bfloat16)

    b_qkv = jnp.concatenate([p['bqkv'][:, 0 * D:1 * D] * scale,
                             p['bqkv'][:, 1 * D:3 * D]], axis=-1)  # (L, 3D)
    b_qkv = jnp.pad(b_qkv, ((0, 0), (0, VEC_W - 3 * D)))

    vec = jnp.zeros((L, N_VEC, VEC_W), jnp.float32)

    def put(v, row, val):
        return v.at[:, row, :val.shape[-1]].set(val)

    vec = put(vec, 0, p['ln1g']); vec = put(vec, 1, p['ln1b'])
    vec = put(vec, 2, b_qkv)
    vec = put(vec, 3, p['bo'])
    vec = put(vec, 4, p['ln2g']); vec = put(vec, 5, p['ln2b'])
    vec = put(vec, 6, p['bfc']); vec = put(vec, 7, p['bpj'])
    vec = vec.at[L - 1, 8, :D].set(p['lnfg'])       # ln_final rides in the last layer slab
    vec = vec.at[L - 1, 9, :D].set(p['lnfb'])

    tproj = jnp.zeros((D, P_PAD), jnp.float32).at[:, :P].set(p['tproj'])
    return dict(pos=p['pos'],
                w_qkv=w_qkv,
                w_o=p['wo'].astype(jnp.bfloat16),
                w_fc=p['wfc'].astype(jnp.bfloat16),
                w_pj=p['wpj'].astype(jnp.bfloat16),
                vec=vec,
                tproj=tproj.astype(jnp.bfloat16))


@jax.jit
def text_encoder(prompts, tokenized_prompts, packed):
    # EOT pooling selector built where argmax already runs (XLA): one-hot over the
    # flat (BT*S) rows of the owning batch tile -> a single matmul inside the kernel.
    eot_idx = jnp.argmax(tokenized_prompts, axis=-1).astype(jnp.int32)           # (B,)
    local = (jnp.arange(B, dtype=jnp.int32) % BT) * S + eot_idx                  # (B,)
    sel = jax.nn.one_hot(local, BT * S, dtype=jnp.float32)                       # (B, BT*S)

    # loop-invariant causal mask (CLIP build_attention_mask): strictly-upper = -inf
    idx = jnp.arange(S)
    mask = jnp.where(idx[None, :] <= idx[:, None], 0.0, -jnp.inf).astype(jnp.float32)

    out_padded = pl.pallas_call(
        text_encoder_kernel,
        out_shape=jax.ShapeDtypeStruct((B, P_PAD), jnp.float32),
        grid_spec=pltpu.PrefetchScalarGridSpec(
            num_scalar_prefetch=0,
            grid=(NB, L),                        # (parallel batch tiles, layers)
            in_specs=[
                pl.BlockSpec((BT, S, D), lambda nb, l: (nb, 0, 0)),            # prompts
                pl.BlockSpec((S, D), lambda nb, l: (0, 0)),                    # pos emb
                pl.BlockSpec((S, S), lambda nb, l: (0, 0)),                    # causal mask
                pl.BlockSpec((BT, BT * S), lambda nb, l: (nb, 0)),             # EOT selector
                pl.BlockSpec((1, D, QKV_PAD), lambda nb, l: (l, 0, 0)),        # fused qkv W
                pl.BlockSpec((1, D, D), lambda nb, l: (l, 0, 0)),              # out-proj W
                pl.BlockSpec((1, D, MLP), lambda nb, l: (l, 0, 0)),            # c_fc W
                pl.BlockSpec((1, MLP, D), lambda nb, l: (l, 0, 0)),            # c_proj W
                pl.BlockSpec((1, N_VEC, VEC_W), lambda nb, l: (l, 0, 0)),      # bias/LN slab
                pl.BlockSpec((D, P_PAD), lambda nb, l: (0, 0)),                # text_projection
            ],
            out_specs=pl.BlockSpec((BT, P_PAD), lambda nb, l: (nb, 0)),
            scratch_shapes=[pltpu.VMEM((BT * S, D), jnp.float32)],             # residual
        ),
        compiler_params=pltpu.CompilerParams(
            dimension_semantics=("parallel", "arbitrary"),
            # Explicit scoped-VMEM budget: covers double-buffered per-layer weight slabs
            # at toy size with large headroom; re-derive (<~48 MiB on v7x, >16 MiB default
            # on v5e) when scaling to real CLIP (D=512, MLP=2048, S=77, L=12).
            vmem_limit_bytes=32 * 1024 * 1024),
        cost_estimate=pl.CostEstimate(
            flops=_FLOPS, transcendentals=_TRANS, bytes_accessed=_BYTES),
    )(prompts, packed['pos'], mask, sel, packed['w_qkv'], packed['w_o'],
      packed['w_fc'], packed['w_pj'], packed['vec'], packed['tproj'])

    return out_padded[:, :P]


if __name__ == "__main__":
    key = jax.random.PRNGKey(0)
    kp, kt = jax.random.split(key)
    prompts = jax.random.normal(kp, (B, S, D), jnp.float32)
    # tokenized prompts: integer ids; argmax(-1) picks the EOT position per row
    tokenized_prompts = jax.random.randint(kt, (B, S), 0, 100).astype(jnp.int32)
    params = make_params(jax.random.PRNGKey(42))
    packed = pack_params(params)

    out = text_encoder(prompts, tokenized_prompts, packed)
    out = jax.block_until_ready(out)
    assert out.shape == (B, P) and out.dtype == jnp.float32
    assert bool(jnp.all(jnp.isfinite(out)))
    print("KERNEL_OK")
</pallas_src>

<mosaic_0001>
module attributes {stable_mosaic.version = 11 : i64} {
  func.func @text_encoder_kernel(%arg0: i32, %arg1: i32, %arg2: memref<2x8x32xf32, #tpu.memory_space<vmem>>, %arg3: memref<8x32xf32, #tpu.memory_space<vmem>>, %arg4: memref<8x8xf32, #tpu.memory_space<vmem>>, %arg5: memref<2x16xf32, #tpu.memory_space<vmem>>, %arg6: memref<1x32x128xbf16, #tpu.memory_space<vmem>>, %arg7: memref<1x32x32xbf16, #tpu.memory_space<vmem>>, %arg8: memref<1x32x128xbf16, #tpu.memory_space<vmem>>, %arg9: memref<1x128x32xbf16, #tpu.memory_space<vmem>>, %arg10: memref<1x10x128xf32, #tpu.memory_space<vmem>>, %arg11: memref<32x128xbf16, #tpu.memory_space<vmem>>, %arg12: memref<2x128xf32, #tpu.memory_space<vmem>>, %arg13: memref<16x32xf32, #tpu.memory_space<vmem>>) attributes {dimension_semantics = [#tpu.dimension_semantics<parallel>, #tpu.dimension_semantics<arbitrary>], iteration_bounds = array<i64: 1, 2>, scalar_prefetch = 0 : i64, scratch_operands = 1 : i64, tpu.core_type = #tpu.core_type<tc>, window_params = [{transform_indices = @transform_0, window_bounds = array<i64: 2, 8, 32>}, {pipeline_mode = #tpu.pipeline_mode<synchronous>, transform_indices = @transform_1, window_bounds = array<i64: 8, 32>}, {pipeline_mode = #tpu.pipeline_mode<synchronous>, transform_indices = @transform_2, window_bounds = array<i64: 8, 8>}, {transform_indices = @transform_3, window_bounds = array<i64: 2, 16>}, {transform_indices = @transform_4, window_bounds = array<i64: 1, 32, 128>}, {transform_indices = @transform_5, window_bounds = array<i64: 1, 32, 32>}, {transform_indices = @transform_6, window_bounds = array<i64: 1, 32, 128>}, {transform_indices = @transform_7, window_bounds = array<i64: 1, 128, 32>}, {transform_indices = @transform_8, window_bounds = array<i64: 1, 10, 128>}, {pipeline_mode = #tpu.pipeline_mode<synchronous>, transform_indices = @transform_9, window_bounds = array<i64: 32, 128>}, {transform_indices = @transform_10, window_bounds = array<i64: 2, 128>}]} {
    %c0_i32 = arith.constant 0 : i32
    %0 = arith.cmpi eq, %arg1, %c0_i32 : i32
    %1 = arith.extui %0 : i1 to i32
    %c0_i32_0 = arith.constant 0 : i32
    %2 = arith.cmpi ne, %1, %c0_i32_0 : i32
    scf.if %2 {
      %c0_42 = arith.constant 0 : index
      %c0_43 = arith.constant 0 : index
      %c0_44 = arith.constant 0 : index
      %147 = vector.load %arg2[%c0_42, %c0_43, %c0_44] : memref<2x8x32xf32, #tpu.memory_space<vmem>>, vector<2x8x32xf32>
      %c0_45 = arith.constant 0 : index
      %c0_46 = arith.constant 0 : index
      %148 = vector.load %arg3[%c0_45, %c0_46] : memref<8x32xf32, #tpu.memory_space<vmem>>, vector<8x32xf32>
      %149 = vector.shape_cast %148 : vector<8x32xf32> to vector<1x8x32xf32>
      %150 = vector.broadcast %149 : vector<1x8x32xf32> to vector<2x8x32xf32>
      %151 = arith.addf %147, %150 : vector<2x8x32xf32>
      %152 = vector.shape_cast %151 : vector<2x8x32xf32> to vector<16x32xf32>
      %c0_47 = arith.constant 0 : index
      %c0_48 = arith.constant 0 : index
      %153 = vector.load %arg13[%c0_47, %c0_48] : memref<16x32xf32, #tpu.memory_space<vmem>>, vector<16x32xf32>
      tpu.vector_store %arg13[%c0_47, %c0_48], %152 {strides = array<i32>} : memref<16x32xf32, #tpu.memory_space<vmem>>, vector<16x32xf32>,
    } else {
    }
    %c0 = arith.constant 0 : index
    %c0_1 = arith.constant 0 : index
    %c0_2 = arith.constant 0 : index
    %3 = vector.load %arg10[%c0, %c0_1, %c0_2] : memref<1x10x128xf32, #tpu.memory_space<vmem>>, vector<1x10x128xf32>
    %4 = vector.shape_cast %3 : vector<1x10x128xf32> to vector<10x128xf32>
    %5 = vector.extract_strided_slice %4 {offsets = [0, 0], sizes = [1, 32], strides = [1, 1]} : vector<10x128xf32> to vector<1x32xf32>
    %6 = vector.shape_cast %5 : vector<1x32xf32> to vector<32xf32>
    %7 = vector.extract_strided_slice %4 {offsets = [1, 0], sizes = [1, 32], strides = [1, 1]} : vector<10x128xf32> to vector<1x32xf32>
    %8 = vector.shape_cast %7 : vector<1x32xf32> to vector<32xf32>
    %9 = vector.extract_strided_slice %4 {offsets = [2, 0], sizes = [1, 128], strides = [1, 1]} : vector<10x128xf32> to vector<1x128xf32>
    %10 = vector.shape_cast %9 : vector<1x128xf32> to vector<128xf32>
    %11 = vector.extract_strided_slice %4 {offsets = [3, 0], sizes = [1, 32], strides = [1, 1]} : vector<10x128xf32> to vector<1x32xf32>
    %12 = vector.shape_cast %11 : vector<1x32xf32> to vector<32xf32>
    %13 = vector.extract_strided_slice %4 {offsets = [4, 0], sizes = [1, 32], strides = [1, 1]} : vector<10x128xf32> to vector<1x32xf32>
    %14 = vector.shape_cast %13 : vector<1x32xf32> to vector<32xf32>
    %15 = vector.extract_strided_slice %4 {offsets = [5, 0], sizes = [1, 32], strides = [1, 1]} : vector<10x128xf32> to vector<1x32xf32>
    %16 = vector.shape_cast %15 : vector<1x32xf32> to vector<32xf32>
    %17 = vector.extract_strided_slice %4 {offsets = [6, 0], sizes = [1, 128], strides = [1, 1]} : vector<10x128xf32> to vector<1x128xf32>
    %18 = vector.shape_cast %17 : vector<1x128xf32> to vector<128xf32>
    %19 = vector.extract_strided_slice %4 {offsets = [7, 0], sizes = [1, 32], strides = [1, 1]} : vector<10x128xf32> to vector<1x32xf32>
    %20 = vector.shape_cast %19 : vector<1x32xf32> to vector<32xf32>
    %c0_3 = arith.constant 0 : index
    %c0_4 = arith.constant 0 : index
    %21 = vector.load %arg13[%c0_3, %c0_4] : memref<16x32xf32, #tpu.memory_space<vmem>>, vector<16x32xf32>
    %cst = arith.constant dense<0.000000e+00> : vector<16xf32>
    %22 = vector.multi_reduction <add>, %21, %cst [1] : vector<16x32xf32> to vector<16xf32>
    %23 = vector.shape_cast %22 : vector<16xf32> to vector<16x1xf32>
    %cst_5 = arith.constant 3.200000e+01 : f32
    %24 = vector.broadcast %cst_5 : f32 to vector<16x1xf32>
    %25 = arith.divf %23, %24 : vector<16x1xf32>
    %26 = vector.broadcast %25 : vector<16x1xf32> to vector<16x32xf32>
    %27 = arith.subf %21, %26 : vector<16x32xf32>
    %28 = arith.mulf %27, %27 : vector<16x32xf32>
    %cst_6 = arith.constant dense<0.000000e+00> : vector<16xf32>
    %29 = vector.multi_reduction <add>, %28, %cst_6 [1] : vector<16x32xf32> to vector<16xf32>
    %30 = vector.shape_cast %29 : vector<16xf32> to vector<16x1xf32>
    %cst_7 = arith.constant 3.200000e+01 : f32
    %31 = vector.broadcast %cst_7 : f32 to vector<16x1xf32>
    %32 = arith.divf %30, %31 : vector<16x1xf32>
    %33 = vector.broadcast %25 : vector<16x1xf32> to vector<16x32xf32>
    %34 = arith.subf %21, %33 : vector<16x32xf32>
    %cst_8 = arith.constant 9.99999974E-6 : f32
    %35 = vector.broadcast %cst_8 : f32 to vector<16x1xf32>
    %36 = arith.addf %32, %35 : vector<16x1xf32>
    %37 = math.rsqrt %36 : vector<16x1xf32>
    %38 = vector.broadcast %37 : vector<16x1xf32> to vector<16x32xf32>
    %39 = arith.mulf %34, %38 : vector<16x32xf32>
    %40 = vector.shape_cast %6 : vector<32xf32> to vector<1x32xf32>
    %41 = vector.broadcast %40 : vector<1x32xf32> to vector<16x32xf32>
    %42 = arith.mulf %39, %41 : vector<16x32xf32>
    %43 = vector.shape_cast %8 : vector<32xf32> to vector<1x32xf32>
    %44 = vector.broadcast %43 : vector<1x32xf32> to vector<16x32xf32>
    %45 = arith.addf %42, %44 : vector<16x32xf32>
    %46 = arith.truncf %45 : vector<16x32xf32> to vector<16x32xbf16>
    %c0_9 = arith.constant 0 : index
    %c0_10 = arith.constant 0 : index
    %c0_11 = arith.constant 0 : index
    %47 = vector.load %arg6[%c0_9, %c0_10, %c0_11] : memref<1x32x128xbf16, #tpu.memory_space<vmem>>, vector<1x32x128xbf16>
    %48 = vector.shape_cast %47 : vector<1x32x128xbf16> to vector<32x128xbf16>
    %cst_12 = arith.constant dense<0.000000e+00> : vector<16x128xf32>
    %49 = tpu.matmul %46, %48, %cst_12 {dimension_numbers = #tpu.dot_dimension_numbers<[1], [0], [0], [1], [0, 0, 1, 1], [], []>} : vector<16x32xbf16>, vector<32x128xbf16>, vector<16x128xf32> -> vector<16x128xf32>
    %50 = vector.shape_cast %10 : vector<128xf32> to vector<1x128xf32>
    %51 = vector.broadcast %50 : vector<1x128xf32> to vector<16x128xf32>
    %52 = arith.addf %49, %51 : vector<16x128xf32>
    %53 = vector.extract_strided_slice %52 {offsets = [0, 0], sizes = [16, 32], strides = [1, 1]} : vector<16x128xf32> to vector<16x32xf32>
    %54 = vector.extract_strided_slice %52 {offsets = [0, 32], sizes = [16, 32], strides = [1, 1]} : vector<16x128xf32> to vector<16x32xf32>
    %55 = vector.extract_strided_slice %52 {offsets = [0, 64], sizes = [16, 32], strides = [1, 1]} : vector<16x128xf32> to vector<16x32xf32>
    %56 = vector.shape_cast %53 : vector<16x32xf32> to vector<2x8x4x8xf32>
    %57 = tpu.transpose %56, [0, 2, 1, 3] : vector<2x8x4x8xf32> -> vector<2x4x8x8xf32>
    %58 = vector.shape_cast %57 : vector<2x4x8x8xf32> to vector<8x8x8xf32>
    %59 = arith.truncf %58 : vector<8x8x8xf32> to vector<8x8x8xbf16>
    %60 = vector.shape_cast %54 : vector<16x32xf32> to vector<2x8x4x8xf32>
    %61 = tpu.transpose %60, [0, 2, 1, 3] : vector<2x8x4x8xf32> -> vector<2x4x8x8xf32>
    %62 = vector.shape_cast %61 : vector<2x4x8x8xf32> to vector<8x8x8xf32>
    %63 = arith.truncf %62 : vector<8x8x8xf32> to vector<8x8x8xbf16>
    %64 = vector.shape_cast %55 : vector<16x32xf32> to vector<2x8x4x8xf32>
    %65 = tpu.transpose %64, [0, 2, 1, 3] : vector<2x8x4x8xf32> -> vector<2x4x8x8xf32>
    %66 = vector.shape_cast %65 : vector<2x4x8x8xf32> to vector<8x8x8xf32>
    %67 = arith.truncf %66 : vector<8x8x8xf32> to vector<8x8x8xbf16>
    "tpu.trace_start"() <{level = 10 : i32, message = "nqd,nkd->nqk"}> : () -> ()
    %cst_13 = arith.constant dense<0.000000e+00> : vector<8x8x8xf32>
    %68 = tpu.matmul %59, %63, %cst_13 {dimension_numbers = #tpu.dot_dimension_numbers<[2], [2], [1], [1], [0, 0, 0, 1, 1, 1], [0], [0]>} : vector<8x8x8xbf16>, vector<8x8x8xbf16>, vector<8x8x8xf32> -> vector<8x8x8xf32>
    "tpu.trace_stop"() : () -> ()
    %c0_14 = arith.constant 0 : index
    %c0_15 = arith.constant 0 : index
    %69 = vector.load %arg4[%c0_14, %c0_15] : memref<8x8xf32, #tpu.memory_space<vmem>>, vector<8x8xf32>
    %70 = vector.shape_cast %69 : vector<8x8xf32> to vector<1x8x8xf32>
    %71 = vector.broadcast %70 : vector<1x8x8xf32> to vector<8x8x8xf32>
    %72 = arith.addf %68, %71 : vector<8x8x8xf32>
    %cst_16 = arith.constant dense<0xFF800000> : vector<8x8xf32>
    %73 = vector.multi_reduction <maximumf>, %72, %cst_16 [2] : vector<8x8x8xf32> to vector<8x8xf32>
    %74 = vector.shape_cast %73 : vector<8x8xf32> to vector<8x8x1xf32>
    %75 = vector.broadcast %74 : vector<8x8x1xf32> to vector<8x8x8xf32>
    %76 = arith.subf %72, %75 : vector<8x8x8xf32>
    %77 = math.exp %76 : vector<8x8x8xf32>
    %cst_17 = arith.constant dense<0.000000e+00> : vector<8x8xf32>
    %78 = vector.multi_reduction <add>, %77, %cst_17 [2] : vector<8x8x8xf32> to vector<8x8xf32>
    %79 = vector.shape_cast %78 : vector<8x8xf32> to vector<8x8x1xf32>
    %80 = tpu.reciprocal %79 {approx = true} : vector<8x8x1xf32> -> vector<8x8x1xf32>
    %81 = vector.broadcast %80 : vector<8x8x1xf32> to vector<8x8x8xf32>
    %82 = arith.mulf %77, %81 : vector<8x8x8xf32>
    %83 = arith.truncf %82 : vector<8x8x8xf32> to vector<8x8x8xbf16>
    "tpu.trace_start"() <{level = 10 : i32, message = "nqk,nkd->nqd"}> : () -> ()
    %cst_18 = arith.constant dense<0.000000e+00> : vector<8x8x8xf32>
    %84 = tpu.matmul %83, %67, %cst_18 {dimension_numbers = #tpu.dot_dimension_numbers<[2], [1], [1], [2], [0, 0, 0, 1, 1, 2], [0], [0]>} : vector<8x8x8xbf16>, vector<8x8x8xbf16>, vector<8x8x8xf32> -> vector<8x8x8xf32>
    "tpu.trace_stop"() : () -> ()
    %85 = vector.shape_cast %84 : vector<8x8x8xf32> to vector<2x4x8x8xf32>
    %86 = tpu.transpose %85, [0, 2, 1, 3] : vector<2x4x8x8xf32> -> vector<2x8x4x8xf32>
    %87 = vector.shape_cast %86 : vector<2x8x4x8xf32> to vector<16x32xf32>
    %88 = arith.truncf %87 : vector<16x32xf32> to vector<16x32xbf16>
    %c0_19 = arith.constant 0 : index
    %c0_20 = arith.constant 0 : index
    %c0_21 = arith.constant 0 : index
    %89 = vector.load %arg7[%c0_19, %c0_20, %c0_21] : memref<1x32x32xbf16, #tpu.memory_space<vmem>>, vector<1x32x32xbf16>
    %90 = vector.shape_cast %89 : vector<1x32x32xbf16> to vector<32x32xbf16>
    %cst_22 = arith.constant dense<0.000000e+00> : vector<16x32xf32>
    %91 = tpu.matmul %88, %90, %cst_22 {dimension_numbers = #tpu.dot_dimension_numbers<[1], [0], [0], [1], [0, 0, 1, 1], [], []>} : vector<16x32xbf16>, vector<32x32xbf16>, vector<16x32xf32> -> vector<16x32xf32>
    %92 = vector.shape_cast %12 : vector<32xf32> to vector<1x32xf32>
    %93 = vector.broadcast %92 : vector<1x32xf32> to vector<16x32xf32>
    %94 = arith.addf %91, %93 : vector<16x32xf32>
    %95 = arith.addf %21, %94 : vector<16x32xf32>
    %cst_23 = arith.constant dense<0.000000e+00> : vector<16xf32>
    %96 = vector.multi_reduction <add>, %95, %cst_23 [1] : vector<16x32xf32> to vector<16xf32>
    %97 = vector.shape_cast %96 : vector<16xf32> to vector<16x1xf32>
    %cst_24 = arith.constant 3.200000e+01 : f32
    %98 = vector.broadcast %cst_24 : f32 to vector<16x1xf32>
    %99 = arith.divf %97, %98 : vector<16x1xf32>
    %100 = vector.broadcast %99 : vector<16x1xf32> to vector<16x32xf32>
    %101 = arith.subf %95, %100 : vector<16x32xf32>
    %102 = arith.mulf %101, %101 : vector<16x32xf32>
    %cst_25 = arith.constant dense<0.000000e+00> : vector<16xf32>
    %103 = vector.multi_reduction <add>, %102, %cst_25 [1] : vector<16x32xf32> to vector<16xf32>
    %104 = vector.shape_cast %103 : vector<16xf32> to vector<16x1xf32>
    %cst_26 = arith.constant 3.200000e+01 : f32
    %105 = vector.broadcast %cst_26 : f32 to vector<16x1xf32>
    %106 = arith.divf %104, %105 : vector<16x1xf32>
    %107 = vector.broadcast %99 : vector<16x1xf32> to vector<16x32xf32>
    %108 = arith.subf %95, %107 : vector<16x32xf32>
    %cst_27 = arith.constant 9.99999974E-6 : f32
    %109 = vector.broadcast %cst_27 : f32 to vector<16x1xf32>
    %110 = arith.addf %106, %109 : vector<16x1xf32>
    %111 = math.rsqrt %110 : vector<16x1xf32>
    %112 = vector.broadcast %111 : vector<16x1xf32> to vector<16x32xf32>
    %113 = arith.mulf %108, %112 : vector<16x32xf32>
    %114 = vector.shape_cast %14 : vector<32xf32> to vector<1x32xf32>
    %115 = vector.broadcast %114 : vector<1x32xf32> to vector<16x32xf32>
    %116 = arith.mulf %113, %115 : vector<16x32xf32>
    %117 = vector.shape_cast %16 : vector<32xf32> to vector<1x32xf32>
    %118 = vector.broadcast %117 : vector<1x32xf32> to vector<16x32xf32>
    %119 = arith.addf %116, %118 : vector<16x32xf32>
    %120 = arith.truncf %119 : vector<16x32xf32> to vector<16x32xbf16>
    %c0_28 = arith.constant 0 : index
    %c0_29 = arith.constant 0 : index
    %c0_30 = arith.constant 0 : index
    %121 = vector.load %arg8[%c0_28, %c0_29, %c0_30] : memref<1x32x128xbf16, #tpu.memory_space<vmem>>, vector<1x32x128xbf16>
    %122 = vector.shape_cast %121 : vector<1x32x128xbf16> to vector<32x128xbf16>
    %cst_31 = arith.constant dense<0.000000e+00> : vector<16x128xf32>
    %123 = tpu.matmul %120, %122, %cst_31 {dimension_numbers = #tpu.dot_dimension_numbers<[1], [0], [0], [1], [0, 0, 1, 1], [], []>} : vector<16x32xbf16>, vector<32x128xbf16>, vector<16x128xf32> -> vector<16x128xf32>
    %124 = vector.shape_cast %18 : vector<128xf32> to vector<1x128xf32>
    %125 = vector.broadcast %124 : vector<1x128xf32> to vector<16x128xf32>
    %126 = arith.addf %123, %125 : vector<16x128xf32>
    %cst_32 = arith.constant -1.702000e+00 : f32
    %127 = vector.broadcast %cst_32 : f32 to vector<16x128xf32>
    %128 = arith.mulf %127, %126 : vector<16x128xf32>
    %129 = math.exp %128 : vector<16x128xf32>
    %cst_33 = arith.constant 1.000000e+00 : f32
    %130 = vector.broadcast %cst_33 : f32 to vector<16x128xf32>
    %131 = arith.addf %130, %129 : vector<16x128xf32>
    %cst_34 = arith.constant 1.000000e+00 : f32
    %132 = vector.broadcast %cst_34 : f32 to vector<16x128xf32>
    %133 = arith.divf %132, %131 : vector<16x128xf32>
    %134 = arith.mulf %126, %133 : vector<16x128xf32>
    %135 = arith.truncf %134 : vector<16x128xf32> to vector<16x128xbf16>
    %c0_35 = arith.constant 0 : index
    %c0_36 = arith.constant 0 : index
    %c0_37 = arith.constant 0 : index
    %136 = vector.load %arg9[%c0_35, %c0_36, %c0_37] : memref<1x128x32xbf16, #tpu.memory_space<vmem>>, vector<1x128x32xbf16>
    %137 = vector.shape_cast %136 : vector<1x128x32xbf16> to vector<128x32xbf16>
    %cst_38 = arith.constant dense<0.000000e+00> : vector<16x32xf32>
    %138 = tpu.matmul %135, %137, %cst_38 {dimension_numbers = #tpu.dot_dimension_numbers<[1], [0], [0], [1], [0, 0, 1, 1], [], []>} : vector<16x128xbf16>, vector<128x32xbf16>, vector<16x32xf32> -> vector<16x32xf32>
    %139 = vector.shape_cast %20 : vector<32xf32> to vector<1x32xf32>
    %140 = vector.broadcast %139 : vector<1x32xf32> to vector<16x32xf32>
    %141 = arith.addf %138, %140 : vector<16x32xf32>
    %142 = arith.addf %95, %141 : vector<16x32xf32>
    %c0_39 = arith.constant 0 : index
    %c0_40 = arith.constant 0 : index
    %143 = vector.load %arg13[%c0_39, %c0_40] : memref<16x32xf32, #tpu.memory_space<vmem>>, vector<16x32xf32>
    tpu.vector_store %arg13[%c0_39, %c0_40], %142 {strides = array<i32>} : memref<16x32xf32, #tpu.memory_space<vmem>>, vector<16x32xf32>,
    %c1_i32 = arith.constant 1 : i32
    %144 = arith.cmpi eq, %arg1, %c1_i32 : i32
    %145 = arith.extui %144 : i1 to i32
    %c0_i32_41 = arith.constant 0 : i32
    %146 = arith.cmpi ne, %145, %c0_i32_41 : i32
    scf.if %146 {
      %147 = vector.extract_strided_slice %4 {offsets = [8, 0], sizes = [1, 32], strides = [1, 1]} : vector<10x128xf32> to vector<1x32xf32>
      %148 = vector.shape_cast %147 : vector<1x32xf32> to vector<32xf32>
      %149 = vector.extract_strided_slice %4 {offsets = [9, 0], sizes = [1, 32], strides = [1, 1]} : vector<10x128xf32> to vector<1x32xf32>
      %150 = vector.shape_cast %149 : vector<1x32xf32> to vector<32xf32>
      %cst_42 = arith.constant dense<0.000000e+00> : vector<16xf32>
      %151 = vector.multi_reduction <add>, %142, %cst_42 [1] : vector<16x32xf32> to vector<16xf32>
      %152 = vector.shape_cast %151 : vector<16xf32> to vector<16x1xf32>
      %cst_43 = arith.constant 3.200000e+01 : f32
      %153 = vector.broadcast %cst_43 : f32 to vector<16x1xf32>
      %154 = arith.divf %152, %153 : vector<16x1xf32>
      %155 = vector.broadcast %154 : vector<16x1xf32> to vector<16x32xf32>
      %156 = arith.subf %142, %155 : vector<16x32xf32>
      %157 = arith.mulf %156, %156 : vector<16x32xf32>
      %cst_44 = arith.constant dense<0.000000e+00> : vector<16xf32>
      %158 = vector.multi_reduction <add>, %157, %cst_44 [1] : vector<16x32xf32> to vector<16xf32>
      %159 = vector.shape_cast %158 : vector<16xf32> to vector<16x1xf32>
      %cst_45 = arith.constant 3.200000e+01 : f32
      %160 = vector.broadcast %cst_45 : f32 to vector<16x1xf32>
      %161 = arith.divf %159, %160 : vector<16x1xf32>
      %162 = vector.broadcast %154 : vector<16x1xf32> to vector<16x32xf32>
      %163 = arith.subf %142, %162 : vector<16x32xf32>
      %cst_46 = arith.constant 9.99999974E-6 : f32
      %164 = vector.broadcast %cst_46 : f32 to vector<16x1xf32>
      %165 = arith.addf %161, %164 : vector<16x1xf32>
      %166 = math.rsqrt %165 : vector<16x1xf32>
      %167 = vector.broadcast %166 : vector<16x1xf32> to vector<16x32xf32>
      %168 = arith.mulf %163, %167 : vector<16x32xf32>
      %169 = vector.shape_cast %148 : vector<32xf32> to vector<1x32xf32>
      %170 = vector.broadcast %169 : vector<1x32xf32> to vector<16x32xf32>
      %171 = arith.mulf %168, %170 : vector<16x32xf32>
      %172 = vector.shape_cast %150 : vector<32xf32> to vector<1x32xf32>
      %173 = vector.broadcast %172 : vector<1x32xf32> to vector<16x32xf32>
      %174 = arith.addf %171, %173 : vector<16x32xf32>
      %c0_47 = arith.constant 0 : index
      %c0_48 = arith.constant 0 : index
      %175 = vector.load %arg5[%c0_47, %c0_48] : memref<2x16xf32, #tpu.memory_space<vmem>>, vector<2x16xf32>
      %cst_49 = arith.constant dense<0.000000e+00> : vector<2x32xf32>
      %176 = tpu.matmul %175, %174, %cst_49 {dimension_numbers = #tpu.dot_dimension_numbers<[1], [0], [0], [1], [0, 0, 1, 1], [], []>} : vector<2x16xf32>, vector<16x32xf32>, vector<2x32xf32> -> vector<2x32xf32>
      %177 = arith.truncf %176 : vector<2x32xf32> to vector<2x32xbf16>
      %c0_50 = arith.constant 0 : index
      %c0_51 = arith.constant 0 : index
      %178 = vector.load %arg11[%c0_50, %c0_51] : memref<32x128xbf16, #tpu.memory_space<vmem>>, vector<32x128xbf16>
      %cst_52 = arith.constant dense<0.000000e+00> : vector<2x128xf32>
      %179 = tpu.matmul %177, %178, %cst_52 {dimension_numbers = #tpu.dot_dimension_numbers<[1], [0], [0], [1], [0, 0, 1, 1], [], []>} : vector<2x32xbf16>, vector<32x128xbf16>, vector<2x128xf32> -> vector<2x128xf32>
      %c0_53 = arith.constant 0 : index
      %c0_54 = arith.constant 0 : index
      %180 = vector.load %arg12[%c0_53, %c0_54] : memref<2x128xf32, #tpu.memory_space<vmem>>, vector<2x128xf32>
      tpu.vector_store %arg12[%c0_53, %c0_54], %179 {strides = array<i32>} : memref<2x128xf32, #tpu.memory_space<vmem>>, vector<2x128xf32>,
    } else {
    }
    return
  }
  func.func @transform_0(%arg0: i32, %arg1: i32) -> (i32, i32, i32) {
    %c0_i32 = arith.constant 0 : i32
    %c0_i32_0 = arith.constant 0 : i32
    %c0_i32_1 = arith.constant 0 : i32
    return %arg0, %c0_i32, %c0_i32_0 : i32, i32, i32
  }
  func.func @transform_1(%arg0: i32, %arg1: i32) -> (i32, i32) {
    %c0_i32 = arith.constant 0 : i32
    %c0_i32_0 = arith.constant 0 : i32
    %c0_i32_1 = arith.constant 0 : i32
    return %c0_i32, %c0_i32_0 : i32, i32
  }
  func.func @transform_2(%arg0: i32, %arg1: i32) -> (i32, i32) {
    %c0_i32 = arith.constant 0 : i32
    %c0_i32_0 = arith.constant 0 : i32
    %c0_i32_1 = arith.constant 0 : i32
    return %c0_i32, %c0_i32_0 : i32, i32
  }
  func.func @transform_3(%arg0: i32, %arg1: i32) -> (i32, i32) {
    %c0_i32 = arith.constant 0 : i32
    %c0_i32_0 = arith.constant 0 : i32
    return %arg0, %c0_i32 : i32, i32
  }
  func.func @transform_4(%arg0: i32, %arg1: i32) -> (i32, i32, i32) {
    %c0_i32 = arith.constant 0 : i32
    %c0_i32_0 = arith.constant 0 : i32
    %c0_i32_1 = arith.constant 0 : i32
    return %arg1, %c0_i32, %c0_i32_0 : i32, i32, i32
  }
  func.func @transform_5(%arg0: i32, %arg1: i32) -> (i32, i32, i32) {
    %c0_i32 = arith.constant 0 : i32
    %c0_i32_0 = arith.constant 0 : i32
    %c0_i32_1 = arith.constant 0 : i32
    return %arg1, %c0_i32, %c0_i32_0 : i32, i32, i32
  }
  func.func @transform_6(%arg0: i32, %arg1: i32) -> (i32, i32, i32) {
    %c0_i32 = arith.constant 0 : i32
    %c0_i32_0 = arith.constant 0 : i32
    %c0_i32_1 = arith.constant 0 : i32
    return %arg1, %c0_i32, %c0_i32_0 : i32, i32, i32
  }
  func.func @transform_7(%arg0: i32, %arg1: i32) -> (i32, i32, i32) {
    %c0_i32 = arith.constant 0 : i32
    %c0_i32_0 = arith.constant 0 : i32
    %c0_i32_1 = arith.constant 0 : i32
    return %arg1, %c0_i32, %c0_i32_0 : i32, i32, i32
  }
  func.func @transform_8(%arg0: i32, %arg1: i32) -> (i32, i32, i32) {
    %c0_i32 = arith.constant 0 : i32
    %c0_i32_0 = arith.constant 0 : i32
    %c0_i32_1 = arith.constant 0 : i32
    return %arg1, %c0_i32, %c0_i32_0 : i32, i32, i32
  }
  func.func @transform_9(%arg0: i32, %arg1: i32) -> (i32, i32) {
    %c0_i32 = arith.constant 0 : i32
    %c0_i32_0 = arith.constant 0 : i32
    %c0_i32_1 = arith.constant 0 : i32
    return %c0_i32, %c0_i32_0 : i32, i32
  }
  func.func @transform_10(%arg0: i32, %arg1: i32) -> (i32, i32) {
    %c0_i32 = arith.constant 0 : i32
    %c0_i32_0 = arith.constant 0 : i32
    return %arg0, %c0_i32 : i32, i32
  }
}

</mosaic_0001>

<bundles_post_ra>
// kernel: text_encoder.1
= control target key start
LH: loop header
LB: loop body
LE: loop exit
PB: predicated region body
PF: predicated region fallthrough
CT: control target
= control target key end

     0   :  { %15 = vsyncpa [#allocation4], 0  ;;  %s2902_s13 = smov 0   ;;  %s2904_s14 = smov 0   ;;  %s3545_s0 = inlined_call_operand.vmem [shape: f32[2,8,32], index: 0, kind: input, shape index: {}]   ;;  %s3546_s1 = inlined_call_operand.vmem [shape: f32[8,32], index: 1, kind: input, shape index: {}]   ;;  %s3547_s2 = inlined_call_operand.vmem [shape: f32[8,8], index: 2, kind: input, shape index: {}]   ;;  %s3548_s3 = inlined_call_operand.vmem [shape: f32[2,16], index: 3, kind: input, shape index: {}]   ;;  %s3549_s4 = inlined_call_operand.vmem [shape: bf16[2,32,128], index: 4, kind: input, shape index: {}]   ;;  %s3550_s5 = inlined_call_operand.vmem [shape: bf16[2,32,32], index: 5, kind: input, shape index: {}]   ;;  %s3551_s6 = inlined_call_operand.vmem [shape: bf16[2,32,128], index: 6, kind: input, shape index: {}]   ;;  %s3552_s7 = inlined_call_operand.vmem [shape: bf16[2,128,32], index: 7, kind: input, shape index: {}]   ;;  %s3553_s8 = inlined_call_operand.vmem [shape: f32[2,10,128], index: 8, kind: input, shape index: {}]   ;;  %s3554_s9 = inlined_call_operand.vmem [shape: bf16[32,128], index: 9, kind: input, shape index: {}]   ;;  %s3555_s10 = inlined_call_operand.hbm [shape: f32[2,128], index: 10, kind: output, shape index: {}]  }
   0x1   :  { %s2906_s15 = smov 0  }
   0x2 LB: > { %s30_s17 = sadd.s32 1, %s2829_s14  ;;  %p2502_p1 = scmp.ge.s32.totalorder %s2833_s15, 1  ;;  %s2833_s15 = sphi %s2906_s15, %s21_s15   ;;  %s2829_s14 = sphi %s2904_s14, %s3558_s14   ;;  %s2825_s13 = sphi %s2902_s13, %s3557_s13  }
   0x3   : > { %p31_p0 = scmp.ge.s32.totalorder %s30_s17, 2  ;;  %p385_p2 = scmp.lt.s32.totalorder %s2833_s15, 3 }
   0x5   : > { %s3560_s17 = smov (%p31_p0, %s30_s17), 0  ;;  %p386_p3 = pnand %p2502_p1, %p385_p2 }
   0x6   : > { %p457_p4 = scmp.lt.s32.totalorder (!%p386_p3), %s2825_s13, 1  ;;  %p2513_p5 = scmp.ne.s32.totalorder (!%p386_p3), %s2825_s13, 0 }
   0x7   : > { %389 = sbr.rel (%p386_p3) target bundleno = 2673 (0xa71), region = 60 }
   0xc   : > { %s458_s18 = scalar_select %p457_p4, %s2825_s13, 1 }
   0xd   : > { %486 = sbr.rel (%p2513_p5) target bundleno = 24 (0x18), region = 64 }
   0xe   : > { %s2604_s19 = sshll.u32 %s458_s18, 4  ;;  %s2607_s20 = sshll.u32 %s458_s18, 6 }
   0xf   : > { %s2928_s23 = scalar_lea.vmem %s3549_s4, %s2604_s19  ;;  %s2933_s26 = scalar_lea.vmem %s3550_s5, %s2604_s19 }
  0x10   : > { %s2938_s29 = scalar_lea.vmem %s3551_s6, %s2604_s19  ;;  %s2943_s12 = scalar_lea.vmem %s3552_s7, %s2607_s20 }
  0x11   : > { %s2948_s21 = scalar_lea.vmem %s3553_s8, %s2604_s19 }
  0x12   : > { %v487_v0 = vld [vmem:[%s3545_s0] sm:$0xff]  ;;  %vm492_vm0 = vcmask 261120   ;;  %v488_v2 = vld [vmem:[%s3545_s0 + $0x8] sm:$0xff] }
  0x13   : > { %v489_v1 = vld [vmem:[%s3546_s1] sm:$0xff] }
  0x14   : > { %v490_v3 = vadd.f32 %v489_v1, %v487_v0  ;;  %v491_v4 = vadd.f32 %v489_v1, %v488_v2 }
  0x16   : > { %493 = vst.msk [vmem:[#allocation2] sm:$0xff] %vm492_vm0, %v490_v3 }
  0x17   : > { %494 = vst.msk [vmem:[#allocation2 + $0x8] sm:$0xff] %vm492_vm0, %v491_v4 }
  0x18 PF: > { %vm499_vm1 = vcmask 261120   ;;  %v2835_v9 = vmov 32.0   ;;  %v2610_v26 = vld [vmem:[%s2928_s23 + $0x8] sm:$0xff]  ;;  %v2609_v29 = vld [vmem:[%s2928_s23] sm:$0xff]  ;;  %s2836_s16 = smov 104   ;;  %s2837_s19 = smov 120  }
  0x19   : > { %2722 = vrcp.f32 %v2835_v9  ;;  %v2970_v27 = vld [vmem:[%s2948_s21 + $0x8] sm:$0x3]  ;;  %584 = vmatpush.bf16.msra.mxu0 %v2610_v26  ;;  %v495_v46 = vld [vmem:[%s2948_s21] sm:$0xff]  ;;  %s2838_s23 = smov 112   ;;  %s2839_s30 = smov 96   ;;  %vm613_vm9 = vcmask 1047556  }
  0x1a   : > { %v551_v49 = vperm.slane %v495_v46, 0  ;;  %v554_v54 = vperm.slane %v495_v46, 1  ;;  %v562_v59 = vperm.slane %v495_v46, 2  ;;  %v2840_v3 = vmov 1983009808   ;;  %s2842_s22 = smov 64  }
  0x1b   : > { %v618_v4 = vunpack.c.l.s4 %v2840_v3  ;;  %vm1346_vm10 = vcmask 64512   ;;  %vm1598_vm11 = vcmask 1043456   ;;  %s2843_s24 = smov 16   ;;  %s2844_s25 = smov 24   ;;  %vm1994_vm12 = vcmask 130048  }
  0x1c   : > { %s2845_s27 = smov 8   ;;  %vm1997_vm13 = vcmask 195584   ;;  %p2589_p6 = scmp.ne.s32.totalorder %s2825_s13, 1 }
  0x1d   : > { %v497_v5 = vld [vmem:[#allocation2] sm:$0xff]  ;;  %585 = vmatpush.bf16.msra.mxu0 %v2609_v29 }
  0x1e   : > { %v500_v6 = vsel %vm499_vm1, %v497_v5, 0.0  ;;  %v498_v7 = vld [vmem:[#allocation2 + $0x8] sm:$0xff] }
  0x1f   : > { %501 = vadd.xlane.f32.xlu0 %v500_v6  ;;  %v503_v8 = vsel %vm499_vm1, %v498_v7, 0.0  ;;  %v2723_v10 = vpop.eup %2722 }
  0x20   : > { %v507_v11 = vmul.f32 32.0, %v2723_v10  ;;  %vm511_vm2 = vweird.f32 %v2723_v10 }
  0x22   : > { %v508_v12 = vsub.f32 1.0, %v507_v11  ;;  %v2841_v11 = vmov 1934713408  }
  0x24   : > { %v509_v13 = vmul.f32 %v2723_v10, %v508_v12  ;;  %v642_v12 = vunpack.c.l.s4 %v2841_v11 }
  0x26   : > { %v510_v14 = vadd.f32 %v2723_v10, %v509_v13 }
  0x27   : > { %504 = vadd.xlane.f32.xlu0 %v503_v8  ;;  %v2988_v8 = vunpack.c.0.s8 %v618_v4 }
  0x28   : > { %v2962_v15 = vsel %vm511_vm2, %v2723_v10, %v510_v14 }
  0x92   : > { %v502_v16 = vpop.xlane.xlu0 %501 }
  0x93   : > { %v513_v17 = vmul.f32 %v2962_v15, %v502_v16 }
  0x95   : > { %v515_v18 = vsub.f32 %v497_v5, %v513_v17 }
  0x97   : > { %v517_v19 = vmul.f32 %v515_v18, %v515_v18 }
  0x99   : > { %v519_v20 = vsel %vm499_vm1, %v517_v19, 0.0  ;;  %v2996_v19 = vunpack.c.0.s8 %v642_v12 }
  0x9a   : > { %520 = vadd.xlane.f32.xlu1 %v519_v20  ;;  %v505_v21 = vpop.xlane.xlu0 %504 }
  0x9b   : > { %v514_v22 = vmul.f32 %v2962_v15, %v505_v21 }
  0x9d   : > { %v516_v23 = vsub.f32 %v498_v7, %v514_v22 }
  0x9f   : > { %v518_v24 = vmul.f32 %v516_v23, %v516_v23 }
  0xa1   : > { %v522_v25 = vsel %vm499_vm1, %v518_v24, 0.0 }
  0xa2   : > { %523 = vadd.xlane.f32.xlu1 %v522_v25 }
 0x10d   : > { %v521_v28 = vpop.xlane.xlu1 %520 }
 0x10e   : > { %v525_v30 = vmul.f32 %v521_v28, %v2962_v15 }
 0x110   : > { %v527_v31 = vadd.f32 1e-05, %v525_v30 }
 0x112   : > { %2724 = vrsqrt.f32 %v527_v31  ;;  %vm535_vm4 = vweird.f32 %v527_v31 }
 0x115   : > { %v524_v32 = vpop.xlane.xlu1 %523 }
 0x116   : > { %v526_v33 = vmul.f32 %v524_v32, %v2962_v15 }
 0x118   : > { %v2725_v34 = vpop.eup %2724  ;;  %v528_v35 = vadd.f32 1e-05, %v526_v33 }
 0x119   : > { %v530_v36 = vmul.f32 %v2725_v34, %v527_v31  ;;  %vm536_vm3 = vweird.f32 %v2725_v34 }
 0x11a   : > { %2726 = vrsqrt.f32 %v528_v35  ;;  %vm537_vm5 = vmor %vm535_vm4, %vm536_vm3  ;;  %vm545_vm7 = vweird.f32 %v528_v35 }
 0x11b   : > { %v531_v37 = vmul.f32 %v2725_v34, %v530_v36 }
 0x11d   : > { %v532_v38 = vmul.f32 0.5, %v531_v37 }
 0x11f   : > { %v533_v39 = vsub.f32 1.5, %v532_v38 }
 0x120   : > { %v2727_v40 = vpop.eup %2726 }
 0x121   : > { %v534_v41 = vmul.f32 %v2725_v34, %v533_v39  ;;  %v540_v42 = vmul.f32 %v2727_v40, %v528_v35  ;;  %vm546_vm6 = vweird.f32 %v2727_v40 }
 0x122   : > { %vm547_vm8 = vmor %vm545_vm7, %vm546_vm6 }
 0x123   : > { %v541_v43 = vmul.f32 %v2727_v40, %v540_v42  ;;  %v538_v44 = vsel %vm537_vm5, %v2725_v34, %v534_v41 }
 0x124   : > { %v549_v48 = vmul.f32 %v538_v44, %v515_v18 }
 0x125   : > { %v542_v45 = vmul.f32 0.5, %v541_v43 }
 0x126   : > { %v552_v53 = vmul.f32 %v551_v49, %v549_v48 }
 0x127   : > { %v543_v47 = vsub.f32 1.5, %v542_v45 }
 0x128   : > { %v555_v56 = vadd.f32 %v554_v54, %v552_v53 }
 0x129   : > { %v544_v50 = vmul.f32 %v2727_v40, %v543_v47 }
 0x12b   : > { %v548_v51 = vsel %vm547_vm8, %v2727_v40, %v544_v50 }
 0x12c   : > { %v550_v52 = vmul.f32 %v548_v51, %v516_v23 }
 0x12e   : > { %v553_v55 = vmul.f32 %v551_v49, %v550_v52 }
 0x130   : > { %v556_v57 = vadd.f32 %v554_v54, %v553_v55 }
 0x132   : > { %v557_v58 = vpack.c.bf16 %v556_v57, %v555_v56 }
 0x134   : > { %2522 = vmatmul.msk.bf16.vlgmr.msra.gmra.mxu0 %vm499_vm1, %v557_v58 }
 0x1b1   : > { %v587_v60 = vpop.f32.mrf.mxu0 }
 0x1b2   : > { %v588_v61 = vadd.f32 %v587_v60, %v562_v59 }
 0x1b4   : > { %606 = vrot.lane.b32.xlu0 %v588_v61, %s2836_s16  ;;  %594 = vrot.lane.b32.xlu2 %v588_v61, %s2837_s19  ;;  %v615_v7 = vrot.slane %v588_v61, 4 }
 0x1b9   : > { %v589_v62 = vpop.f32.mrf.mxu0 }
 0x1ba   : > { %v2977_v63 = vadd.f32 %v589_v62, %v562_v59 }
 0x1bc   : > { %596 = vrot.lane.b32.xlu1 %v2977_v63, %s2837_s19  ;;  %600 = vrot.lane.b32.xlu2 %v588_v61, %s2838_s23 }
 0x1c4   : > { %602 = vrot.lane.b32.xlu2 %v2977_v63, %s2838_s23 }
 0x1cc   : > { %608 = vrot.lane.b32.xlu2 %v2977_v63, %s2836_s16 }
 0x20e   : > { %v595_v0 = vpop.permute.xlu2 %594 }
 0x20f   : > { %v2982_v1 = vpack.i.bf16 %v595_v0, %v588_v61  ;;  %v627_v14 = vrot.slane %v595_v0, 4 }
 0x211   : > { %2668 = vrot.lane.b32.xlu2 %v2982_v1, %s2839_s30 }
 0x216   : > { %v601_v2 = vpop.permute.xlu2 %600 }
 0x217   : > { %v612_v6 = vrot.slane %v601_v2, 4  ;;  %v616_v9 = vsel %vm613_vm9, %v601_v2, %v615_v7 }
 0x218   : > { %v624_v13 = vperm.slane %v616_v9, %v2988_v8 }
 0x219   : > { %v614_v10 = vsel %vm613_vm9, %v612_v6, %v588_v61 }
 0x21a   : > { %v620_v16 = vperm.slane %v614_v10, %v2988_v8  ;;  %v651_v23 = vrot.slane %v624_v13, 4 }
 0x21c   : > { %v639_v28 = vrot.slane %v620_v16, 4 }
 0x21e   : > { %v2986_v5 = vpop.permute.xlu2 %602 }
 0x226   : > { %v607_v17 = vpop.permute.xlu0 %606  ;;  %v2994_v18 = vpop.permute.xlu2 %608 }
 0x227   : > { %v625_v20 = vrot.slane %v607_v17, 4  ;;  %v628_v21 = vsel %vm613_vm9, %v607_v17, %v627_v14  ;;  %v2999_v22 = vpack.i.bf16 %v607_v17, %v601_v2  ;;  %v3004_v25 = vpack.i.bf16 %v2994_v18, %v2986_v5 }
 0x228   : > { %v636_v24 = vperm.slane %v628_v21, %v2988_v8 }
 0x229   : > { %v626_v26 = vsel %vm613_vm9, %v625_v20, %v595_v0  ;;  %2673 = vrot.lane.b32.xlu0 %v2999_v22, %s2839_s30  ;;  %2683 = vrot.lane.b32.xlu1 %v3004_v25, %s2839_s30 }
 0x22a   : > { %v632_v29 = vperm.slane %v626_v26, %v2988_v8  ;;  %v649_v30 = vrot.slane %v636_v24, 4  ;;  %v652_v31 = vsel %vm613_vm9, %v636_v24, %v651_v23  ;;  %v669_v24 = vrot.slane %v2986_v5, 4 }
 0x22b   : > { %v660_v32 = vperm.slane %v652_v31, %v2996_v19  ;;  %v671_v26 = vrot.slane %v2977_v63, 4 }
 0x22c   : > { %v637_v33 = vrot.slane %v632_v29, 4  ;;  %v640_v34 = vsel %vm613_vm9, %v632_v29, %v639_v28  ;;  %v650_v35 = vsel %vm613_vm9, %v649_v30, %v624_v13  ;;  %v681_v29 = vrot.slane %v2994_v18, 4 }
 0x22d   : > { %v648_v36 = vperm.slane %v640_v34, %v2996_v19  ;;  %v656_v37 = vperm.slane %v650_v35, %v2996_v19  ;;  %v667_v38 = vrot.slane %v660_v32, 4  ;;  %v670_v30 = vsel %vm613_vm9, %v669_v24, %v2977_v63 }
 0x22e   : > { %v638_v39 = vsel %vm613_vm9, %v637_v33, %v620_v16  ;;  %v597_v40 = vpop.permute.xlu1 %596  ;;  %v672_v31 = vsel %vm613_vm9, %v2986_v5, %v671_v26  ;;  %v676_v34 = vperm.slane %v670_v30, %v2988_v8 }
 0x22f   : > { %v644_v41 = vperm.slane %v638_v39, %v2996_v19  ;;  %v663_v42 = vrot.slane %v648_v36, 4  ;;  %v665_v43 = vrot.slane %v656_v37, 4  ;;  %v668_v44 = vsel %vm613_vm9, 0.0, %v667_v38 }
 0x230   : > { %v736_v45 = vsel %vm613_vm9, %v667_v38, %v656_v37  ;;  %v741_v46 = vrot.slane %v668_v44, 4  ;;  %v3025_v49 = vpack.i.bf16 %v597_v40, %v2977_v63  ;;  %v683_v28 = vrot.slane %v597_v40, 4 }
 0x231   : > { %v664_v47 = vsel %vm613_vm9, 0.0, %v663_v42  ;;  %v666_v48 = vsel %vm613_vm9, 0.0, %v665_v43  ;;  %v661_v51 = vrot.slane %v644_v41, 4  ;;  %v725_v52 = vsel %vm613_vm9, %v663_v42, %v644_v41 }
 0x232   : > { %v730_v50 = vrot.slane %v664_v47, 4  ;;  %2678 = vrot.lane.b32.xlu2 %v3025_v49, %s2839_s30  ;;  %v729_v53 = vperm.slane %v725_v52, %v2988_v8  ;;  %v740_v55 = vperm.slane %v736_v45, %v2988_v8  ;;  %v742_v56 = vsel %vm613_vm9, %v741_v46, %v666_v48 }
 0x233   : > { %v662_v54 = vsel %vm613_vm9, 0.0, %v661_v51  ;;  %v746_v59 = vperm.slane %v742_v56, %v2988_v8  ;;  %v682_v32 = vsel %vm613_vm9, %v681_v29, %v597_v40  ;;  %v684_v33 = vsel %vm613_vm9, %v2994_v18, %v683_v28 }
 0x234   : > { %v731_v57 = vsel %vm613_vm9, %v730_v50, %v662_v54  ;;  %v749_v60 = vrot.slane %v729_v53, 4  ;;  %v761_v61 = vrot.slane %v740_v55, 4  ;;  %v680_v35 = vperm.slane %v672_v31, %v2988_v8 }
 0x235   : > { %v735_v58 = vperm.slane %v731_v57, %v2988_v8  ;;  %v759_v6 = vrot.slane %v746_v59, 4  ;;  %v688_v36 = vperm.slane %v682_v32, %v2988_v8  ;;  %v692_v37 = vperm.slane %v684_v33, %v2988_v8 }
 0x236   : > { %v762_v0 = vsel %vm613_vm9, %v746_v59, %v761_v61  ;;  %v695_v38 = vrot.slane %v676_v34, 4  ;;  %v707_v39 = vrot.slane %v680_v35, 4 }
 0x237   : > { %v750_v62 = vsel %vm613_vm9, %v735_v58, %v749_v60  ;;  %v770_v3 = vperm.slane %v762_v0, %v2996_v19  ;;  %v747_v4 = vrot.slane %v735_v58, 4  ;;  %v760_v11 = vsel %vm613_vm9, %v759_v6, %v740_v55 }
 0x238   : > { %v758_v2 = vperm.slane %v750_v62, %v2996_v19  ;;  %v766_v14 = vperm.slane %v760_v11, %v2996_v19  ;;  %v693_v41 = vrot.slane %v688_v36, 4  ;;  %v696_v63 = vsel %vm613_vm9, %v688_v36, %v695_v38 }
 0x239   : > { %v775_v7 = vrot.slane %v770_v3, 4  ;;  %v748_v10 = vsel %vm613_vm9, %v747_v4, %v729_v53  ;;  %v705_v42 = vrot.slane %v692_v37, 4  ;;  %v708_v5 = vsel %vm613_vm9, %v692_v37, %v707_v39 }
 0x23a   : > { %v777_v9 = vrot.slane %v758_v2, 4  ;;  %v754_v13 = vperm.slane %v748_v10, %v2996_v19  ;;  %v771_v17 = vrot.slane %v766_v14, 4  ;;  %v694_v40 = vsel %vm613_vm9, %v693_v41, %v676_v34 }
 0x23b   : > { %v3044_v12 = vsel %vm613_vm9, %v775_v7, %v758_v2  ;;  %v704_v18 = vperm.slane %v696_v63, %v2996_v19  ;;  %v716_v43 = vperm.slane %v708_v5, %v2996_v19  ;;  %v706_v44 = vsel %vm613_vm9, %v705_v42, %v680_v35 }
 0x23c   : > { %v3049_v16 = vsel %vm613_vm9, %v770_v3, %v777_v9  ;;  %v773_v20 = vrot.slane %v754_v13, 4  ;;  %v3052_v21 = vsel %vm613_vm9, %v771_v17, %v754_v13  ;;  %v700_v46 = vperm.slane %v694_v40, %v2996_v19 }
 0x23d   : > { %v712_v47 = vperm.slane %v706_v44, %v2996_v19  ;;  %v719_v48 = vrot.slane %v704_v18, 4  ;;  %v723_v50 = vrot.slane %v716_v43, 4 }
 0x23e   : > { %v3055_v23 = vsel %vm613_vm9, %v766_v14, %v773_v20  ;;  %v717_v51 = vrot.slane %v700_v46, 4 }
 0x23f   : > { %v720_v52 = vsel %vm613_vm9, 0.0, %v719_v48  ;;  %v721_v53 = vrot.slane %v712_v47, 4  ;;  %v724_v54 = vsel %vm613_vm9, 0.0, %v723_v50  ;;  %v779_v57 = vsel %vm613_vm9, %v719_v48, %v700_v46 }
 0x240   : > { %v718_v56 = vsel %vm613_vm9, 0.0, %v717_v51  ;;  %v784_v58 = vrot.slane %v720_v52, 4  ;;  %v795_v59 = vrot.slane %v724_v54, 4  ;;  %v790_v61 = vsel %vm613_vm9, %v723_v50, %v712_v47 }
 0x241   : > { %v722_v60 = vsel %vm613_vm9, 0.0, %v721_v53  ;;  %v3086_v4 = vperm.slane %v779_v57, %v2988_v8  ;;  %v3092_v9 = vperm.slane %v790_v61, %v2988_v8 }
 0x242   : > { %v3089_v7 = vsel %vm613_vm9, %v784_v58, %v718_v56  ;;  %v3095_v10 = vsel %vm613_vm9, %v795_v59, %v722_v60 }
 0x26b   : > { %v2669_v45 = vpop.permute.xlu2 %2668 }
 0x26c   : > { %v2671_v62 = vunpack.i.h.bf16 %v2669_v45  ;;  %v2670_v0 = vunpack.i.l.bf16 %v2669_v45 }
 0x26e   : > { %v879_v11 = vrot.slane %v2671_v62, 4  ;;  %v867_v13 = vrot.slane %v2670_v0, 4 }
 0x28c   : > { %v2679_v55 = vpop.permute.xlu2 %2678 }
 0x28d   : > { %v2681_v2 = vunpack.i.h.bf16 %v2679_v55  ;;  %v2680_v3 = vunpack.i.l.bf16 %v2679_v55 }
 0x28f   : > { %v935_v24 = vrot.slane %v2681_v2, 4  ;;  %v923_v26 = vrot.slane %v2680_v3, 4 }
 0x29b   : > { %v2674_v6 = vpop.permute.xlu0 %2673  ;;  %v2684_v20 = vpop.permute.xlu1 %2683 }
 0x29c   : > { %v2676_v14 = vunpack.i.h.bf16 %v2674_v6  ;;  %v2675_v17 = vunpack.i.l.bf16 %v2674_v6  ;;  %v2686_v28 = vunpack.i.h.bf16 %v2684_v20  ;;  %v2685_v29 = vunpack.i.l.bf16 %v2684_v20 }
 0x29e   : > { %v877_v30 = vrot.slane %v2676_v14, 4  ;;  %v865_v31 = vrot.slane %v2675_v17, 4  ;;  %v868_v32 = vsel %vm613_vm9, %v2675_v17, %v867_v13  ;;  %v880_v33 = vsel %vm613_vm9, %v2676_v14, %v879_v11 }
 0x29f   : > { %v876_v34 = vperm.slane %v868_v32, %v2988_v8  ;;  %v888_v35 = vperm.slane %v880_v33, %v2988_v8  ;;  %v933_v36 = vrot.slane %v2686_v28, 4  ;;  %v921_v37 = vrot.slane %v2685_v29, 4 }
 0x2a0   : > { %v866_v38 = vsel %vm613_vm9, %v865_v31, %v2670_v0  ;;  %v878_v39 = vsel %vm613_vm9, %v877_v30, %v2671_v62  ;;  %v924_v41 = vsel %vm613_vm9, %v2685_v29, %v923_v26  ;;  %v936_v63 = vsel %vm613_vm9, %v2686_v28, %v935_v24 }
 0x2a1   : > { %v872_v42 = vperm.slane %v866_v38, %v2988_v8  ;;  %v884_v5 = vperm.slane %v878_v39, %v2988_v8  ;;  %v901_v40 = vrot.slane %v888_v35, 4  ;;  %v903_v18 = vrot.slane %v876_v34, 4 }
 0x2a2   : > { %v922_v43 = vsel %vm613_vm9, %v921_v37, %v2680_v3  ;;  %v932_v44 = vperm.slane %v924_v41, %v2988_v8  ;;  %v934_v45 = vsel %vm613_vm9, %v933_v36, %v2681_v2  ;;  %v944_v46 = vperm.slane %v936_v63, %v2988_v8 }
 0x2a3   : > { %v889_v47 = vrot.slane %v884_v5, 4  ;;  %v891_v48 = vrot.slane %v872_v42, 4  ;;  %v902_v50 = vsel %vm613_vm9, %v901_v40, %v876_v34  ;;  %v904_v51 = vsel %vm613_vm9, %v888_v35, %v903_v18 }
 0x2a4   : > { %v908_v52 = vperm.slane %v902_v50, %v2996_v19  ;;  %v912_v53 = vperm.slane %v904_v51, %v2996_v19  ;;  %v928_v54 = vperm.slane %v922_v43, %v2988_v8  ;;  %v940_v55 = vperm.slane %v934_v45, %v2988_v8 }
 0x2a5   : > { %v890_v56 = vsel %vm613_vm9, %v889_v47, %v872_v42  ;;  %v892_v57 = vsel %vm613_vm9, %v884_v5, %v891_v48  ;;  %v957_v58 = vrot.slane %v944_v46, 4  ;;  %v959_v59 = vrot.slane %v932_v44, 4 }
 0x2a6   : > { %v896_v60 = vperm.slane %v890_v56, %v2996_v19  ;;  %v900_v61 = vperm.slane %v892_v57, %v2996_v19  ;;  %v917_v62 = vrot.slane %v908_v52, 4  ;;  %v919_v0 = vrot.slane %v912_v53, 4 }
 0x2a7   : > { %v945_v2 = vrot.slane %v940_v55, 4  ;;  %v947_v3 = vrot.slane %v928_v54, 4  ;;  %v958_v6 = vsel %vm613_vm9, %v957_v58, %v932_v44  ;;  %v960_v11 = vsel %vm613_vm9, %v944_v46, %v959_v59 }
 0x2a8   : > { %v913_v13 = vrot.slane %v896_v60, 4  ;;  %v915_v14 = vrot.slane %v900_v61, 4  ;;  %v918_v17 = vsel %vm613_vm9, 0.0, %v917_v62  ;;  %v920_v20 = vsel %vm613_vm9, 0.0, %v919_v0 }
 0x2a9   : > { %v993_v24 = vrot.slane %v920_v20, 4  ;;  %v946_v26 = vsel %vm613_vm9, %v945_v2, %v928_v54  ;;  %v948_v28 = vsel %vm613_vm9, %v940_v55, %v947_v3  ;;  %v964_v29 = vperm.slane %v958_v6, %v2996_v19 }
 0x2aa   : > { %v916_v30 = vsel %vm613_vm9, 0.0, %v915_v14  ;;  %v952_v31 = vperm.slane %v946_v26, %v2996_v19  ;;  %v956_v32 = vperm.slane %v948_v28, %v2996_v19  ;;  %v968_v33 = vperm.slane %v960_v11, %v2996_v19 }
 0x2ab   : > { %v973_v34 = vrot.slane %v964_v29, 4  ;;  %v914_v35 = vsel %vm613_vm9, 0.0, %v913_v13  ;;  %v977_v36 = vsel %vm613_vm9, %v915_v14, %v896_v60  ;;  %v982_v37 = vrot.slane %v916_v30, 4 }
 0x2ac   : > { %v969_v38 = vrot.slane %v952_v31, 4  ;;  %v971_v39 = vrot.slane %v956_v32, 4  ;;  %v975_v41 = vrot.slane %v968_v33, 4  ;;  %v981_v63 = vperm.slane %v977_v36, %v2988_v8 }
 0x2ad   : > { %v974_v42 = vsel %vm613_vm9, 0.0, %v973_v34  ;;  %v983_v5 = vsel %vm613_vm9, %v982_v37, %v914_v35  ;;  %v988_v40 = vsel %vm613_vm9, %v919_v0, %v908_v52  ;;  %v994_v18 = vsel %vm613_vm9, %v993_v24, %v918_v17 }
 0x2ae   : > { %v972_v43 = vsel %vm613_vm9, 0.0, %v971_v39  ;;  %v976_v44 = vsel %vm613_vm9, 0.0, %v975_v41  ;;  %v1042_v45 = vsel %vm613_vm9, %v975_v41, %v964_v29  ;;  %v987_v46 = vperm.slane %v983_v5, %v2988_v8 }
 0x2af   : > { %v1036_v47 = vrot.slane %v972_v43, 4  ;;  %v1047_v48 = vrot.slane %v976_v44, 4  ;;  %v992_v50 = vperm.slane %v988_v40, %v2988_v8  ;;  %v998_v51 = vperm.slane %v994_v18, %v2988_v8 }
 0x2b0   : > { %v1001_v53 = vrot.slane %v981_v63, 4  ;;  %v970_v52 = vsel %vm613_vm9, 0.0, %v969_v38  ;;  %v1031_v54 = vsel %vm613_vm9, %v971_v39, %v952_v31  ;;  %v1046_v55 = vperm.slane %v1042_v45, %v2988_v8 }
 0x2b1   : > { %v1013_v56 = vrot.slane %v992_v50, 4  ;;  %v1035_v57 = vperm.slane %v1031_v54, %v2988_v8  ;;  %v1037_v58 = vsel %vm613_vm9, %v1036_v47, %v970_v52  ;;  %v1048_v59 = vsel %vm613_vm9, %v1047_v48, %v974_v42 }
 0x2b2   : > { %v1002_v60 = vsel %vm613_vm9, %v987_v46, %v1001_v53  ;;  %v1041_v61 = vperm.slane %v1037_v58, %v2988_v8  ;;  %v1052_v62 = vperm.slane %v1048_v59, %v2988_v8  ;;  %v1067_v0 = vrot.slane %v1046_v55, 4 }
 0x2b3   : > { %v1010_v2 = vperm.slane %v1002_v60, %v2996_v19  ;;  %v1014_v3 = vsel %vm613_vm9, %v998_v51, %v1013_v56  ;;  %v1055_v6 = vrot.slane %v1035_v57, 4  ;;  %v999_v11 = vrot.slane %v987_v46, 4 }
 0x2b4   : > { %v1022_v13 = vperm.slane %v1014_v3, %v2996_v19  ;;  %v1068_v14 = vsel %vm613_vm9, %v1052_v62, %v1067_v0  ;;  %v1011_v17 = vrot.slane %v998_v51, 4  ;;  %v1053_v20 = vrot.slane %v1041_v61, 4 }
 0x2b5   : > { %v1056_v24 = vsel %vm613_vm9, %v1041_v61, %v1055_v6  ;;  %v1076_v26 = vperm.slane %v1068_v14, %v2996_v19  ;;  %v1000_v28 = vsel %vm613_vm9, %v999_v11, %v981_v63  ;;  %v1029_v29 = vrot.slane %v1010_v2, 4 }
 0x2b6   : > { %v1027_v30 = vrot.slane %v1022_v13, 4  ;;  %v1064_v31 = vperm.slane %v1056_v24, %v2996_v19  ;;  %v1006_v32 = vperm.slane %v1000_v28, %v2996_v19  ;;  %v1012_v33 = vsel %vm613_vm9, %v1011_v17, %v992_v50 }
 0x2b7   : > { %v1081_v34 = vrot.slane %v1076_v26, 4  ;;  %v1018_v35 = vperm.slane %v1012_v33, %v2996_v19  ;;  %v1030_v36 = vsel %vm613_vm9, %v1022_v13, %v1029_v29  ;;  %v1054_v37 = vsel %vm613_vm9, %v1053_v20, %v1035_v57 }
 0x2b8   : > { %v1028_v38 = vsel %vm613_vm9, %v1027_v30, %v1010_v2  ;;  %v1083_v39 = vrot.slane %v1064_v31, 4  ;;  %v1088_v41 = vpack.c.bf16 %v1030_v36, %v1030_v36  ;;  %v1060_v63 = vperm.slane %v1054_v37, %v2996_v19 }
 0x2b9   : > { %v1087_v42 = vpack.c.bf16 %v1028_v38, %v1028_v38  ;;  %v1082_v5 = vsel %vm613_vm9, %v1081_v34, %v1064_v31  ;;  %v1023_v40 = vrot.slane %v1018_v35, 4  ;;  %v1065_v18 = vrot.slane %v1052_v62, 4 }
 0x2ba   : > { %v1091_v43 = vpack.c.bf16 %v1082_v5, %v1082_v5  ;;  %v1408_v44 = vsel %vm1346_vm10, %v1088_v41, 0  ;;  %v1084_v45 = vsel %vm613_vm9, %v1076_v26, %v1083_v39  ;;  %v1025_v46 = vrot.slane %v1006_v32, 4 }
 0x2bb   : > { %v1389_v47 = vsel %vm1346_vm10, %v1087_v42, 0  ;;  %v1024_v48 = vsel %vm613_vm9, %v1023_v40, %v1006_v32  ;;  %1417 = vmatpush.bf16.xpose.msrb.mxu0 %v1408_v44  ;;  %v1066_v50 = vsel %vm613_vm9, %v1065_v18, %v1046_v55  ;;  %v1092_v51 = vpack.c.bf16 %v1084_v45, %v1084_v45  ;;  %v1345_v40 = vld [vmem:[%s3547_s2] sm:$0xff] }
 0x2bc   : > { %1398 = vmatpush.bf16.xpose.msra.mxu3 %v1389_v47  ;;  %v1465_v53 = vsel %vm1346_vm10, %v1091_v43, 0  ;;  %v1085_v52 = vpack.c.bf16 %v1024_v48, %v1024_v48  ;;  %v1072_v54 = vperm.slane %v1066_v50, %v2996_v19  ;;  %v1026_v56 = vsel %vm613_vm9, %v1018_v35, %v1025_v46 }
 0x2bd   : > { %v1484_v57 = vsel %vm1346_vm10, %v1092_v51, 0  ;;  %v1086_v58 = vpack.c.bf16 %v1026_v56, %v1026_v56  ;;  %v1079_v59 = vrot.slane %v1060_v63, 4  ;;  %v789_v60 = vperm.slane %v3089_v7, %v2988_v8 }
 0x2be   : > { %v1351_v61 = vsel %vm1346_vm10, %v1085_v52, 0  ;;  %v1077_v55 = vrot.slane %v1072_v54, 4  ;;  %v800_v62 = vperm.slane %v3095_v10, %v2988_v8  ;;  %v803_v0 = vrot.slane %v3086_v4, 4 }
 0x2bf   : > { %1360 = vmatpush.bf16.xpose.msra.mxu1 %v1351_v61  ;;  %v1370_v2 = vsel %vm1346_vm10, %v1086_v58, 0  ;;  %v1080_v3 = vsel %vm613_vm9, %v1072_v54, %v1079_v59  ;;  %v815_v6 = vrot.slane %v3092_v9, 4  ;;  %v836_v13 = vpack.c.bf16 %v3049_v16, %v3049_v16 }
 0x2c0   : > { %v1078_v11 = vsel %vm613_vm9, %v1077_v55, %v1060_v63  ;;  %1379 = vmatpush.bf16.xpose.msra.mxu2 %v1370_v2  ;;  %v1090_v7 = vpack.c.bf16 %v1080_v3, %v1080_v3  ;;  %v835_v10 = vpack.c.bf16 %v3044_v12, %v3044_v12  ;;  %v804_v20 = vsel %vm613_vm9, %v789_v60, %v803_v0 }
 0x2c1   : > { %v1089_v14 = vpack.c.bf16 %v1078_v11, %v1078_v11  ;;  %v813_v24 = vrot.slane %v800_v62, 4  ;;  %v816_v28 = vsel %vm613_vm9, %v800_v62, %v815_v6  ;;  %v801_v29 = vrot.slane %v789_v60, 4 }
 0x2c2   : > { %v1446_v17 = vsel %vm1346_vm10, %v1090_v7, 0  ;;  %2526 = vmatmul.msk.bf16.vlgmr.msrb.gmra.mxu0 %vm1346_vm10, %v836_v13  ;;  %v833_v16 = vpack.c.bf16 %v3052_v21, %v3052_v21  ;;  %v834_v12 = vpack.c.bf16 %v3055_v23, %v3055_v23  ;;  %v812_v30 = vperm.slane %v804_v20, %v2996_v19 }
 0x2c3   : > { %1493 = vmatpush.bf16.xpose.msra.mxu0 %v1484_v57  ;;  %v1427_v26 = vsel %vm1346_vm10, %v1089_v14, 0  ;;  %2525 = vmatmul.msk.bf16.vlgmr.msra.gmra.mxu3 %vm1346_vm10, %v835_v10  ;;  %v824_v31 = vperm.slane %v816_v28, %v2996_v19  ;;  %v814_v32 = vsel %vm613_vm9, %v813_v24, %v3092_v9  ;;  %v802_v33 = vsel %vm613_vm9, %v801_v29, %v3086_v4 }
 0x2c4   : > { %1474 = vmatpush.bf16.xpose.msrb.mxu3 %v1465_v53  ;;  %v831_v34 = vrot.slane %v812_v30, 4  ;;  %v820_v21 = vperm.slane %v814_v32, %v2996_v19  ;;  %v808_v23 = vperm.slane %v802_v33, %v2996_v19 }
 0x2c5   : > { %v829_v35 = vrot.slane %v824_v31, 4 }
 0x2c6   : > { %2523 = vmatmul.msk.bf16.vlgmr.msra.gmra.mxu1 %vm1346_vm10, %v833_v16  ;;  %v825_v36 = vrot.slane %v820_v21, 4  ;;  %v832_v37 = vsel %vm613_vm9, %v824_v31, %v831_v34  ;;  %v827_v39 = vrot.slane %v808_v23, 4 }
 0x2c7   : > { %1436 = vmatpush.bf16.xpose.msrb.mxu1 %v1427_v26  ;;  %2524 = vmatmul.msk.bf16.vlgmr.msra.gmra.mxu2 %vm1346_vm10, %v834_v12  ;;  %v830_v38 = vsel %vm613_vm9, %v829_v35, %v812_v30  ;;  %v840_v41 = vpack.c.bf16 %v832_v37, %v832_v37 }
 0x2c8   : > { %1455 = vmatpush.bf16.xpose.msrb.mxu2 %v1446_v17  ;;  %v839_v63 = vpack.c.bf16 %v830_v38, %v830_v38  ;;  %v826_v9 = vsel %vm613_vm9, %v825_v36, %v808_v23  ;;  %v828_v4 = vsel %vm613_vm9, %v820_v21, %v827_v39 }
 0x2c9   : > { %v837_v42 = vpack.c.bf16 %v826_v9, %v826_v9  ;;  %v838_v5 = vpack.c.bf16 %v828_v4, %v828_v4 }
 0x2d2   : > { %2530 = vmatmul.msk.bf16.vlgmr.msra.gmra.mxu0 %vm1346_vm10, %v840_v41 }
 0x2d3   : > { %2529 = vmatmul.msk.bf16.vlgmr.msrb.gmra.mxu3 %vm1346_vm10, %v839_v63 }
 0x2d6   : > { %2527 = vmatmul.msk.bf16.vlgmr.msrb.gmra.mxu1 %vm1346_vm10, %v837_v42 }
 0x2d7   : > { %2528 = vmatmul.msk.bf16.vlgmr.msrb.gmra.mxu2 %vm1346_vm10, %v838_v5 }
 0x33f   : > { %v1419_v18 = vpop.f32.mrf.mxu0 }
 0x340   : > { %v1420_v43 = vadd.f32 %v1419_v18, %v1345_v40 }
 0x342   : > { %v1508_v44 = vsel %vm1346_vm10, %v1420_v43, -inf }
 0x343   : > { %v1362_v45 = vpop.f32.mrf.mxu1  ;;  %1509 = vmax.xlane.f32.xlu0 %v1508_v44 }
 0x344   : > { %v1363_v46 = vadd.f32 %v1362_v45, %v1345_v40 }
 0x346   : > { %v1400_v47 = vpop.f32.mrf.mxu3  ;;  %v1499_v48 = vsel %vm1346_vm10, %v1363_v46, -inf }
 0x347   : > { %v1401_v50 = vadd.f32 %v1400_v47, %v1345_v40  ;;  %1500 = vmax.xlane.f32.xlu1 %v1499_v48  ;;  %v1421_v51 = vpop.f32.mrf.mxu0 }
 0x349   : > { %v1505_v52 = vsel %vm1346_vm10, %v1401_v50, -inf }
 0x34a   : > { %v1381_v53 = vpop.f32.mrf.mxu2 }
 0x34b   : > { %v1364_v54 = vpop.f32.mrf.mxu1  ;;  %v1382_v56 = vadd.f32 %v1381_v53, %v1345_v40  ;;  %1506 = vmax.xlane.f32.xlu0 %v1505_v52 }
 0x34d   : > { %v1502_v57 = vsel %vm1346_vm10, %v1382_v56, -inf }
 0x34e   : > { %v1402_v58 = vpop.f32.mrf.mxu3  ;;  %1503 = vmax.xlane.f32.xlu2 %v1502_v57 }
 0x34f   : > { %v1495_v59 = vpop.f32.mrf.mxu0 }
 0x350   : > { %v3228_v60 = vadd.f32 %v1495_v59, %v1345_v40 }
 0x352   : > { %v1383_v61 = vpop.f32.mrf.mxu2  ;;  %v1520_v62 = vsel %vm1346_vm10, %v3228_v60, -inf }
 0x353   : > { %v1438_v55 = vpop.f32.mrf.mxu1 }
 0x354   : > { %v1439_v0 = vadd.f32 %v1438_v55, %v1345_v40 }
 0x356   : > { %v1476_v2 = vpop.f32.mrf.mxu3  ;;  %1521 = vmax.xlane.f32.xlu2 %v1520_v62  ;;  %v1511_v3 = vsel %vm1346_vm10, %v1439_v0, -inf }
 0x357   : > { %1512 = vmax.xlane.f32.xlu0 %v1511_v3  ;;  %v1497_v6 = vpop.f32.mrf.mxu0  ;;  %v1477_v11 = vadd.f32 %v1476_v2, %v1345_v40 }
 0x359   : > { %v1517_v10 = vsel %vm1346_vm10, %v1477_v11, -inf }
 0x35a   : > { %v1457_v7 = vpop.f32.mrf.mxu2 }
 0x35b   : > { %v1440_v13 = vpop.f32.mrf.mxu1  ;;  %v1458_v14 = vadd.f32 %v1457_v7, %v1345_v40 }
 0x35d   : > { %v1514_v17 = vsel %vm1346_vm10, %v1458_v14, -inf }
 0x35e   : > { %v1478_v20 = vpop.f32.mrf.mxu3  ;;  %1518 = vmax.xlane.f32.xlu2 %v1517_v10  ;;  %1515 = vmax.xlane.f32.xlu1 %v1514_v17 }
 0x362   : > { %v1459_v24 = vpop.f32.mrf.mxu2 }
 0x36b   : > { %2693 = vrot.lane.b32.xlu0 %v2999_v22, %s2842_s22 }
 0x373   : > { %2703 = vrot.lane.b32.xlu0 %v3004_v25, %s2842_s22 }
 0x376   : > { %2698 = vrot.lane.b32.xlu2 %v3025_v49, %s2842_s22 }
 0x377   : > { %2688 = vrot.lane.b32.xlu1 %v2982_v1, %s2842_s22 }
 0x3b6   : > { %v1510_v26 = vpop.xlane.xlu0 %1509 }
 0x3b7   : > { %v1526_v31 = vsub.f32 %v1420_v43, %v1510_v26 }
 0x3b9   : > { %v1537_v25 = vmul.f32 1.442695, %v1526_v31 }
 0x3ba   : > { %v1501_v28 = vpop.xlane.xlu1 %1500 }
 0x3bb   : > { %v1523_v29 = vsub.f32 %v1363_v46, %v1501_v28 }
 0x3bd   : > { %v1531_v16 = vmul.f32 1.442695, %v1523_v29 }
 0x3be   : > { %v1507_v12 = vpop.xlane.xlu0 %1506 }
 0x3bf   : > { %2728 = vpow2.f32 %v1531_v16  ;;  %v1525_v30 = vsub.f32 %v1401_v50, %v1507_v12 }
 0x3c1   : > { %v1535_v32 = vmul.f32 1.442695, %v1525_v30  ;;  %v1504_v33 = vpop.xlane.xlu2 %1503 }
 0x3c2   : > { %v1524_v34 = vsub.f32 %v1382_v56, %v1504_v33 }
 0x3c3   : > { %2730 = vpow2.f32 %v1535_v32 }
 0x3c4   : > { %v1533_v21 = vmul.f32 1.442695, %v1524_v34 }
 0x3c5   : > { %v3239_v22 = vpop.eup %2728 }
 0x3c6   : > { %2732 = vpow2.f32 %v1533_v21  ;;  %v1547_v1 = vsel %vm1346_vm10, %v3239_v22, 0.0 }
 0x3c7   : > { %1548 = vadd.xlane.f32.xlu0 %v1547_v1  ;;  %2734 = vpow2.f32 %v1537_v25 }
 0x3c9   : > { %v3243_v49 = vpop.eup %2730  ;;  %v1522_v35 = vpop.xlane.xlu2 %1521 }
 0x3ca   : > { %v1513_v23 = vpop.xlane.xlu0 %1512  ;;  %v1553_v36 = vsel %vm1346_vm10, %v3243_v49, 0.0  ;;  %v1530_v18 = vsub.f32 %v3228_v60, %v1522_v35 }
 0x3cb   : > { %v1527_v37 = vsub.f32 %v1439_v0, %v1513_v23  ;;  %1554 = vadd.xlane.f32.xlu1 %v1553_v36 }
 0x3cc   : > { %v3247_v38 = vpop.eup %2732  ;;  %v1545_v46 = vmul.f32 1.442695, %v1530_v18 }
 0x3cd   : > { %v1539_v39 = vmul.f32 1.442695, %v1527_v37  ;;  %v1550_v41 = vsel %vm1346_vm10, %v3247_v38, 0.0  ;;  %v3251_v63 = vpop.eup %2734 }
 0x3ce   : > { %1551 = vadd.xlane.f32.xlu2 %v1550_v41  ;;  %v1556_v40 = vsel %vm1346_vm10, %v3251_v63, 0.0 }
 0x3cf   : > { %2736 = vpow2.f32 %v1539_v39 }
 0x3d1   : > { %v1519_v9 = vpop.xlane.xlu2 %1518  ;;  %v1516_v4 = vpop.xlane.xlu1 %1515 }
 0x3d2   : > { %v1529_v42 = vsub.f32 %v1477_v11, %v1519_v9  ;;  %v1528_v5 = vsub.f32 %v1458_v14, %v1516_v4 }
 0x3d3   : > { %1557 = vadd.xlane.f32.xlu1 %v1556_v40 }
 0x3d4   : > { %v1543_v43 = vmul.f32 1.442695, %v1529_v42  ;;  %v1541_v44 = vmul.f32 1.442695, %v1528_v5 }
 0x3d5   : > { %v3256_v45 = vpop.eup %2736 }
 0x3d6   : > { %2738 = vpow2.f32 %v1543_v43  ;;  %v1559_v47 = vsel %vm1346_vm10, %v3256_v45, 0.0 }
 0x3d7   : > { %2740 = vpow2.f32 %v1541_v44 }
 0x3d8   : > { %2742 = vpow2.f32 %v1545_v46 }
 0x3d9   : > { %v2699_v54 = vpop.permute.xlu2 %2698 }
 0x3da   : > { %v2701_v57 = vunpack.i.h.bf16 %v2699_v54  ;;  %v2700_v58 = vunpack.i.l.bf16 %v2699_v54 }
 0x3db   : > { %1560 = vadd.xlane.f32.xlu1 %v1559_v47 }
 0x3dc   : > { %v3260_v48 = vpop.eup %2738  ;;  %v1187_v62 = vrot.slane %v2701_v57, 4  ;;  %v1175_v0 = vrot.slane %v2700_v58, 4 }
 0x3dd   : > { %v3262_v50 = vpop.eup %2740  ;;  %v2694_v51 = vpop.permute.xlu0 %2693  ;;  %v1565_v53 = vsel %vm1346_vm10, %v3260_v48, 0.0 }
 0x3de   : > { %1566 = vadd.xlane.f32.xlu2 %v1565_v53  ;;  %v1562_v52 = vsel %vm1346_vm10, %v3262_v50, 0.0  ;;  %v3268_v56 = vpop.eup %2742  ;;  %v2696_v59 = vunpack.i.h.bf16 %v2694_v51  ;;  %v2695_v60 = vunpack.i.l.bf16 %v2694_v51 }
 0x3df   : > { %1563 = vadd.xlane.f32.xlu0 %v1562_v52  ;;  %v1568_v55 = vsel %vm1346_vm10, %v3268_v56, 0.0 }
 0x3e0   : > { %v1129_v14 = vrot.slane %v2696_v59, 4  ;;  %v1117_v10 = vrot.slane %v2695_v60, 4 }
 0x3e5   : > { %v2704_v61 = vpop.permute.xlu0 %2703 }
 0x3e6   : > { %v2706_v2 = vunpack.i.h.bf16 %v2704_v61  ;;  %v2705_v3 = vunpack.i.l.bf16 %v2704_v61  ;;  %1569 = vadd.xlane.f32.xlu2 %v1568_v55 }
 0x3e8   : > { %v1185_v6 = vrot.slane %v2706_v2, 4  ;;  %v1188_v11 = vsel %vm613_vm9, %v2706_v2, %v1187_v62  ;;  %v1173_v7 = vrot.slane %v2705_v3, 4  ;;  %v1176_v13 = vsel %vm613_vm9, %v2705_v3, %v1175_v0 }
 0x3e9   : > { %v1196_v17 = vperm.slane %v1188_v11, %v2988_v8  ;;  %v1184_v20 = vperm.slane %v1176_v13, %v2988_v8  ;;  %v2689_v24 = vpop.permute.xlu1 %2688 }
 0x3ea   : > { %v1186_v26 = vsel %vm613_vm9, %v1185_v6, %v2701_v57  ;;  %v1174_v28 = vsel %vm613_vm9, %v1173_v7, %v2700_v58  ;;  %v2691_v29 = vunpack.i.h.bf16 %v2689_v24  ;;  %v2690_v16 = vunpack.i.l.bf16 %v2689_v24 }
 0x3eb   : > { %v1192_v12 = vperm.slane %v1186_v26, %v2988_v8  ;;  %v1209_v30 = vrot.slane %v1196_v17, 4  ;;  %v1180_v31 = vperm.slane %v1174_v28, %v2988_v8  ;;  %v1211_v32 = vrot.slane %v1184_v20, 4 }
 0x3ec   : > { %v1130_v33 = vsel %vm613_vm9, %v1129_v14, %v2691_v29  ;;  %v1131_v34 = vrot.slane %v2691_v29, 4  ;;  %v1118_v21 = vsel %vm613_vm9, %v1117_v10, %v2690_v16  ;;  %v1119_v25 = vrot.slane %v2690_v16, 4 }
 0x3ed   : > { %v1197_v1 = vrot.slane %v1192_v12, 4  ;;  %v1199_v35 = vrot.slane %v1180_v31, 4  ;;  %v1210_v23 = vsel %vm613_vm9, %v1209_v30, %v1184_v20  ;;  %v1212_v36 = vsel %vm613_vm9, %v1196_v17, %v1211_v32 }
 0x3ee   : > { %v1216_v37 = vperm.slane %v1210_v23, %v2996_v19  ;;  %v1220_v39 = vperm.slane %v1212_v36, %v2996_v19  ;;  %v1132_v41 = vsel %vm613_vm9, %v2696_v59, %v1131_v34  ;;  %v1136_v9 = vperm.slane %v1130_v33, %v2988_v8 }
 0x3ef   : > { %v1198_v4 = vsel %vm613_vm9, %v1197_v1, %v1180_v31  ;;  %v1200_v42 = vsel %vm613_vm9, %v1192_v12, %v1199_v35  ;;  %v1140_v5 = vperm.slane %v1132_v41, %v2988_v8  ;;  %v1120_v40 = vsel %vm613_vm9, %v2695_v60, %v1119_v25 }
 0x3f0   : > { %v1204_v18 = vperm.slane %v1198_v4, %v2996_v19  ;;  %v1208_v43 = vperm.slane %v1200_v42, %v2996_v19  ;;  %v1225_v44 = vrot.slane %v1216_v37, 4  ;;  %v1227_v46 = vrot.slane %v1220_v39, 4 }
 0x3f1   : > { %v1141_v47 = vrot.slane %v1136_v9, 4  ;;  %v1153_v51 = vrot.slane %v1140_v5, 4  ;;  %v1124_v53 = vperm.slane %v1118_v21, %v2988_v8  ;;  %v1128_v52 = vperm.slane %v1120_v40, %v2988_v8 }
 0x3f2   : > { %v1221_v54 = vrot.slane %v1204_v18, 4  ;;  %v1223_v57 = vrot.slane %v1208_v43, 4  ;;  %v1226_v58 = vsel %vm613_vm9, 0.0, %v1225_v44  ;;  %v1228_v59 = vsel %vm613_vm9, 0.0, %v1227_v46 }
 0x3f3   : > { %v1294_v60 = vsel %vm613_vm9, %v1227_v46, %v1216_v37  ;;  %v1299_v61 = vrot.slane %v1228_v59, 4  ;;  %v1142_v55 = vsel %vm613_vm9, %v1141_v47, %v1124_v53  ;;  %v1143_v62 = vrot.slane %v1124_v53, 4 }
 0x3f4   : > { %v1222_v0 = vsel %vm613_vm9, 0.0, %v1221_v54  ;;  %v1224_v2 = vsel %vm613_vm9, 0.0, %v1223_v57  ;;  %v1283_v3 = vsel %vm613_vm9, %v1223_v57, %v1204_v18  ;;  %v1148_v6 = vperm.slane %v1142_v55, %v2996_v19 }
 0x3f5   : > { %v1288_v11 = vrot.slane %v1224_v2, 4  ;;  %v1144_v7 = vsel %vm613_vm9, %v1136_v9, %v1143_v62  ;;  %v1154_v13 = vsel %vm613_vm9, %v1153_v51, %v1128_v52  ;;  %v1155_v14 = vrot.slane %v1128_v52, 4 }
 0x3f6   : > { %v1152_v10 = vperm.slane %v1144_v7, %v2996_v19  ;;  %v1160_v17 = vperm.slane %v1154_v13, %v2996_v19  ;;  %v1165_v20 = vrot.slane %v1148_v6, 4  ;;  %v1287_v24 = vperm.slane %v1283_v3, %v2988_v8 }
 0x3f7   : > { %v1156_v26 = vsel %vm613_vm9, %v1140_v5, %v1155_v14  ;;  %v1289_v28 = vsel %vm613_vm9, %v1288_v11, %v1222_v0  ;;  %v1298_v29 = vperm.slane %v1294_v60, %v2988_v8  ;;  %v1300_v16 = vsel %vm613_vm9, %v1299_v61, %v1226_v58 }
 0x3f8   : > { %v1164_v12 = vperm.slane %v1156_v26, %v2996_v19  ;;  %v1166_v30 = vsel %vm613_vm9, 0.0, %v1165_v20  ;;  %v1167_v31 = vrot.slane %v1152_v10, 4  ;;  %v1169_v32 = vrot.slane %v1160_v17, 4 }
 0x3f9   : > { %v1293_v33 = vperm.slane %v1289_v28, %v2988_v8  ;;  %v1304_v34 = vperm.slane %v1300_v16, %v2988_v8  ;;  %v1307_v21 = vrot.slane %v1287_v24, 4  ;;  %v1319_v25 = vrot.slane %v1298_v29, 4 }
 0x3fa   : > { %v1168_v1 = vsel %vm613_vm9, 0.0, %v1167_v31  ;;  %v1170_v35 = vsel %vm613_vm9, 0.0, %v1169_v32  ;;  %v1171_v23 = vrot.slane %v1164_v12, 4  ;;  %v1229_v36 = vsel %vm613_vm9, %v1167_v31, %v1148_v6 }
 0x3fb   : > { %v1233_v37 = vperm.slane %v1229_v36, %v2988_v8  ;;  %v1234_v39 = vrot.slane %v1168_v1, 4  ;;  %v1308_v41 = vsel %vm613_vm9, %v1293_v33, %v1307_v21  ;;  %v1320_v9 = vsel %vm613_vm9, %v1304_v34, %v1319_v25 }
 0x3fc   : > { %v1172_v4 = vsel %vm613_vm9, 0.0, %v1171_v23  ;;  %v1240_v42 = vsel %vm613_vm9, %v1171_v23, %v1160_v17  ;;  %v1316_v5 = vperm.slane %v1308_v41, %v2996_v19  ;;  %v1328_v40 = vperm.slane %v1320_v9, %v2996_v19 }
 0x3fd   : > { %v1245_v18 = vrot.slane %v1172_v4, 4  ;;  %v1235_v43 = vsel %vm613_vm9, %v1234_v39, %v1166_v30  ;;  %v1244_v44 = vperm.slane %v1240_v42, %v2988_v8  ;;  %v1253_v46 = vrot.slane %v1233_v37, 4 }
 0x3fe   : > { %v1239_v47 = vperm.slane %v1235_v43, %v2988_v8  ;;  %v1335_v51 = vrot.slane %v1316_v5, 4  ;;  %v1305_v53 = vrot.slane %v1293_v33, 4  ;;  %v1317_v52 = vrot.slane %v1304_v34, 4 }
 0x3ff   : > { %v1246_v54 = vsel %vm613_vm9, %v1245_v18, %v1170_v35  ;;  %v1265_v57 = vrot.slane %v1244_v44, 4  ;;  %v1333_v58 = vrot.slane %v1328_v40, 4 }
 0x400   : > { %v1250_v59 = vperm.slane %v1246_v54, %v2988_v8  ;;  %v1254_v60 = vsel %vm613_vm9, %v1239_v47, %v1253_v46  ;;  %v1336_v61 = vsel %vm613_vm9, %v1328_v40, %v1335_v51  ;;  %v1251_v55 = vrot.slane %v1239_v47, 4 }
 0x401   : > { %v1262_v62 = vperm.slane %v1254_v60, %v2996_v19  ;;  %v1306_v0 = vsel %vm613_vm9, %v1305_v53, %v1287_v24  ;;  %v1318_v2 = vsel %vm613_vm9, %v1317_v52, %v1298_v29  ;;  %v1344_v10 = vpack.c.bf16 %v1336_v61, %v1336_v61 }
 0x402   : > { %v1266_v3 = vsel %vm613_vm9, %v1250_v59, %v1265_v57  ;;  %v1252_v6 = vsel %vm613_vm9, %v1251_v55, %v1233_v37  ;;  %v1263_v11 = vrot.slane %v1250_v59, 4  ;;  %v1312_v7 = vperm.slane %v1306_v0, %v2996_v19 }
 0x403   : > { %v1274_v13 = vperm.slane %v1266_v3, %v2996_v19  ;;  %v1281_v14 = vrot.slane %v1262_v62, 4  ;;  %v1258_v17 = vperm.slane %v1252_v6, %v2996_v19  ;;  %v1324_v26 = vperm.slane %v1318_v2, %v2996_v19 }
 0x404   : > { %v1264_v20 = vsel %vm613_vm9, %v1263_v11, %v1244_v44  ;;  %v1331_v24 = vrot.slane %v1312_v7, 4  ;;  %v1334_v28 = vsel %vm613_vm9, %v1333_v58, %v1316_v5  ;;  %v1733_v39 = vsel %vm1598_vm11, %v1344_v10, 0 }
 0x405   : > { %v1282_v29 = vsel %vm613_vm9, %v1274_v13, %v1281_v14  ;;  %v1270_v16 = vperm.slane %v1264_v20, %v2996_v19  ;;  %v1277_v12 = vrot.slane %v1258_v17, 4  ;;  %v1279_v30 = vrot.slane %v1274_v13, 4 }
 0x406   : > { %v1340_v31 = vpack.c.bf16 %v1282_v29, %v1282_v29  ;;  %v1332_v32 = vsel %vm613_vm9, %v1324_v26, %v1331_v24  ;;  %v1343_v33 = vpack.c.bf16 %v1334_v28, %v1334_v28  ;;  %v1329_v34 = vrot.slane %v1324_v26, 4 }
 0x407   : > { %v1278_v21 = vsel %vm613_vm9, %v1270_v16, %v1277_v12  ;;  %v1280_v25 = vsel %vm613_vm9, %v1279_v30, %v1262_v62  ;;  %v1342_v1 = vpack.c.bf16 %v1332_v32, %v1332_v32  ;;  %v1275_v35 = vrot.slane %v1270_v16, 4 }
 0x408   : > { %v1657_v23 = vsel %vm1598_vm11, %v1340_v31, 0  ;;  %v1338_v36 = vpack.c.bf16 %v1278_v21, %v1278_v21  ;;  %v1339_v37 = vpack.c.bf16 %v1280_v25, %v1280_v25  ;;  %v1330_v9 = vsel %vm613_vm9, %v1329_v34, %v1312_v7 }
 0x409   : > { %1666 = vmatpush.bf16.msrb.mxu0 %v1657_v23  ;;  %v1276_v41 = vsel %vm613_vm9, %v1275_v35, %v1258_v17  ;;  %v1341_v40 = vpack.c.bf16 %v1330_v9, %v1330_v9  ;;  %v1695_v18 = vsel %vm1598_vm11, %v1342_v1, 0  ;;  %v1714_v43 = vsel %vm1598_vm11, %v1343_v33, 0 }
 0x40a   : > { %v1619_v4 = vsel %vm1598_vm11, %v1338_v36, 0  ;;  %v1638_v42 = vsel %vm1598_vm11, %v1339_v37, 0  ;;  %v1337_v5 = vpack.c.bf16 %v1276_v41, %v1276_v41 }
 0x40b   : > { %1628 = vmatpush.bf16.msra.mxu2 %v1619_v4  ;;  %1647 = vmatpush.bf16.msra.mxu3 %v1638_v42  ;;  %v1676_v46 = vsel %vm1598_vm11, %v1341_v40, 0 }
 0x40c   : > { %v1600_v44 = vsel %vm1598_vm11, %v1337_v5, 0 }
 0x40d   : > { %1742 = vmatpush.bf16.msra.mxu0 %v1733_v39  ;;  %1609 = vmatpush.bf16.msra.mxu1 %v1600_v44 }
 0x40f   : > { %1704 = vmatpush.bf16.msrb.mxu2 %v1695_v18  ;;  %1723 = vmatpush.bf16.msrb.mxu3 %v1714_v43 }
 0x411   : > { %1685 = vmatpush.bf16.msrb.mxu1 %v1676_v46 }
 0x43a   : > { %v1549_v47 = vpop.xlane.xlu0 %1548 }
 0x43b   : > { %2744 = vrcp.f32 %v1549_v47 }
 0x43e   : > { %v1555_v51 = vpop.xlane.xlu1 %1554 }
 0x43f   : > { %2746 = vrcp.f32 %v1555_v51 }
 0x441   : > { %v2745_v53 = vpop.eup %2744  ;;  %v1552_v52 = vpop.xlane.xlu2 %1551 }
 0x442   : > { %v1579_v54 = vmul.f32 %v2745_v53, %v3239_v22  ;;  %2748 = vrcp.f32 %v1552_v52 }
 0x444   : > { %v1587_v57 = vpack.c.bf16 %v1579_v54, %v1579_v54 }
 0x445   : > { %v2747_v58 = vpop.eup %2746 }
 0x446   : > { %v1581_v59 = vmul.f32 %v2747_v58, %v3243_v49  ;;  %2531 = vmatmul.msk.bf16.vlgmr.msra.gmra.mxu1 %vm1346_vm10, %v1587_v57  ;;  %v1558_v60 = vpop.xlane.xlu1 %1557 }
 0x447   : > { %2750 = vrcp.f32 %v1558_v60 }
 0x448   : > { %v2749_v61 = vpop.eup %2748  ;;  %v1589_v55 = vpack.c.bf16 %v1581_v59, %v1581_v59 }
 0x449   : > { %v1580_v62 = vmul.f32 %v2749_v61, %v3247_v38 }
 0x44a   : > { %2533 = vmatmul.msk.bf16.vlgmr.msra.gmra.mxu3 %vm1346_vm10, %v1589_v55 }
 0x44b   : > { %v1588_v0 = vpack.c.bf16 %v1580_v62, %v1580_v62 }
 0x44d   : > { %v2751_v2 = vpop.eup %2750  ;;  %2532 = vmatmul.msk.bf16.vlgmr.msra.gmra.mxu2 %vm1346_vm10, %v1588_v0 }
 0x44e   : > { %v1582_v22 = vmul.f32 %v2751_v2, %v3251_v63  ;;  %v1561_v3 = vpop.xlane.xlu1 %1560 }
 0x44f   : > { %2752 = vrcp.f32 %v1561_v3 }
 0x450   : > { %v1590_v6 = vpack.c.bf16 %v1582_v22, %v1582_v22 }
 0x451   : > { %v1567_v49 = vpop.xlane.xlu2 %1566 }
 0x452   : > { %2754 = vrcp.f32 %v1567_v49  ;;  %v1564_v11 = vpop.xlane.xlu0 %1563  ;;  %2534 = vmatmul.msk.bf16.vlgmr.msrb.gmra.mxu0 %vm1346_vm10, %v1590_v6 }
 0x453   : > { %2756 = vrcp.f32 %v1564_v11 }
 0x455   : > { %v2753_v7 = vpop.eup %2752 }
 0x456   : > { %v1583_v38 = vmul.f32 %v2753_v7, %v3256_v45 }
 0x458   : > { %v2755_v13 = vpop.eup %2754  ;;  %v1591_v14 = vpack.c.bf16 %v1583_v38, %v1583_v38 }
 0x459   : > { %v2757_v10 = vpop.eup %2756  ;;  %v1585_v17 = vmul.f32 %v2755_v13, %v3260_v48  ;;  %v1570_v20 = vpop.xlane.xlu2 %1569 }
 0x45a   : > { %v1584_v63 = vmul.f32 %v2757_v10, %v3262_v50  ;;  %2758 = vrcp.f32 %v1570_v20  ;;  %2535 = vmatmul.msk.bf16.vlgmr.msrb.gmra.mxu1 %vm1346_vm10, %v1591_v14 }
 0x45b   : > { %v1593_v26 = vpack.c.bf16 %v1585_v17, %v1585_v17 }
 0x45c   : > { %v1592_v24 = vpack.c.bf16 %v1584_v63, %v1584_v63 }
 0x45d   : > { %2537 = vmatmul.msk.bf16.vlgmr.msrb.gmra.mxu3 %vm1346_vm10, %v1593_v26 }
 0x45e   : > { %2536 = vmatmul.msk.bf16.vlgmr.msrb.gmra.mxu2 %vm1346_vm10, %v1592_v24 }
 0x460   : > { %v2759_v28 = vpop.eup %2758 }
 0x461   : > { %v1586_v45 = vmul.f32 %v2759_v28, %v3268_v56 }
 0x463   : > { %v1594_v29 = vpack.c.bf16 %v1586_v45, %v1586_v45 }
 0x465   : > { %2538 = vmatmul.msk.bf16.vlgmr.msra.gmra.mxu0 %vm1346_vm10, %v1594_v29 }
 0x4c3   : > { %v1611_v16 = vpop.f32.mrf.mxu1 }
 0x4c4   : > { %v1750_v12 = vrot.slane %v1611_v16, 4 }
 0x4cb   : > { %v1613_v48 = vpop.f32.mrf.mxu1 }
 0x4cd   : > { %v1649_v30 = vpop.f32.mrf.mxu3 }
 0x4ce   : > { %v1748_v50 = vrot.slane %v1649_v30, 4  ;;  %v1751_v31 = vsel %vm613_vm9, %v1649_v30, %v1750_v12 }
 0x4cf   : > { %v1759_v32 = vperm.slane %v1751_v31, %v2988_v8  ;;  %v1668_v33 = vpop.f32.mrf.mxu0 }
 0x4d0   : > { %v1630_v34 = vpop.f32.mrf.mxu2  ;;  %v1749_v21 = vsel %vm613_vm9, %v1748_v50, %v1611_v16  ;;  %v1760_v25 = vrot.slane %v1668_v33, 4 }
 0x4d1   : > { %v1762_v1 = vrot.slane %v1630_v34, 4  ;;  %v1755_v56 = vperm.slane %v1749_v21, %v2988_v8  ;;  %v1786_v35 = vrot.slane %v1759_v32, 4 }
 0x4d2   : > { %v1761_v23 = vsel %vm613_vm9, %v1760_v25, %v1630_v34 }
 0x4d3   : > { %v1774_v36 = vrot.slane %v1755_v56, 4  ;;  %v1763_v37 = vsel %vm613_vm9, %v1668_v33, %v1762_v1  ;;  %v1767_v39 = vperm.slane %v1761_v23, %v2988_v8 }
 0x4d4   : > { %v1771_v41 = vperm.slane %v1763_v37, %v2988_v8 }
 0x4d5   : > { %v1772_v9 = vrot.slane %v1767_v39, 4  ;;  %v1775_v4 = vsel %vm613_vm9, %v1767_v39, %v1774_v36  ;;  %v1651_v42 = vpop.f32.mrf.mxu3 }
 0x4d6   : > { %v1783_v5 = vperm.slane %v1775_v4, %v2996_v19  ;;  %v1784_v40 = vrot.slane %v1771_v41, 4  ;;  %v1787_v18 = vsel %vm613_vm9, %v1771_v41, %v1786_v35 }
 0x4d7   : > { %v1773_v43 = vsel %vm613_vm9, %v1772_v9, %v1755_v56  ;;  %v1795_v44 = vperm.slane %v1787_v18, %v2996_v19  ;;  %v1670_v46 = vpop.f32.mrf.mxu0  ;;  %v1687_v47 = vpop.f32.mrf.mxu1 }
 0x4d8   : > { %v1779_v51 = vperm.slane %v1773_v43, %v2996_v19  ;;  %v1785_v53 = vsel %vm613_vm9, %v1784_v40, %v1759_v32  ;;  %v1798_v52 = vrot.slane %v1783_v5, 4  ;;  %v1632_v54 = vpop.f32.mrf.mxu2  ;;  %v1806_v14 = vrot.slane %v1687_v47, 4 }
 0x4d9   : > { %v1791_v57 = vperm.slane %v1785_v53, %v2996_v19  ;;  %v1802_v58 = vrot.slane %v1795_v44, 4 }
 0x4da   : > { %v1796_v59 = vrot.slane %v1779_v51, 4  ;;  %v1799_v60 = vsel %vm613_vm9, 0.0, %v1798_v52  ;;  %v1860_v61 = vsel %vm613_vm9, %v1798_v52, %v1779_v51 }
 0x4db   : > { %v1800_v55 = vrot.slane %v1791_v57, 4  ;;  %v1803_v62 = vsel %vm613_vm9, 0.0, %v1802_v58  ;;  %v1865_v0 = vrot.slane %v1799_v60, 4  ;;  %v1871_v2 = vsel %vm613_vm9, %v1802_v58, %v1791_v57 }
 0x4dc   : > { %v1876_v22 = vrot.slane %v1803_v62, 4  ;;  %v1797_v3 = vsel %vm613_vm9, 0.0, %v1796_v59  ;;  %v1875_v11 = vperm.slane %v1871_v2, %v2988_v8  ;;  %v1864_v38 = vperm.slane %v1860_v61, %v2988_v8 }
 0x4dd   : > { %v1801_v6 = vsel %vm613_vm9, 0.0, %v1800_v55  ;;  %v1866_v49 = vsel %vm613_vm9, %v1865_v0, %v1797_v3 }
 0x4de   : > { %v1877_v7 = vsel %vm613_vm9, %v1876_v22, %v1801_v6  ;;  %v1870_v13 = vperm.slane %v1866_v49, %v2988_v8  ;;  %v1896_v45 = vrot.slane %v1875_v11, 4  ;;  %v1884_v12 = vrot.slane %v1864_v38, 4 }
 0x4df   : > { %v1689_v10 = vpop.f32.mrf.mxu1  ;;  %v1881_v63 = vperm.slane %v1877_v7, %v2988_v8 }
 0x4e0   : > { %v1725_v17 = vpop.f32.mrf.mxu3  ;;  %v1882_v20 = vrot.slane %v1870_v13, 4  ;;  %v1885_v23 = vsel %vm613_vm9, %v1870_v13, %v1884_v12 }
 0x4e1   : > { %v1706_v26 = vpop.f32.mrf.mxu2  ;;  %v1804_v24 = vrot.slane %v1725_v17, 4  ;;  %v1807_v28 = vsel %vm613_vm9, %v1725_v17, %v1806_v14  ;;  %v1894_v1 = vrot.slane %v1881_v63, 4  ;;  %v1897_v36 = vsel %vm613_vm9, %v1881_v63, %v1896_v45 }
 0x4e2   : > { %v1818_v29 = vrot.slane %v1706_v26, 4  ;;  %v1815_v16 = vperm.slane %v1807_v28, %v2988_v8  ;;  %v1744_v48 = vpop.f32.mrf.mxu0  ;;  %v1883_v34 = vsel %vm613_vm9, %v1882_v20, %v1864_v38  ;;  %v1893_v59 = vperm.slane %v1885_v23, %v2996_v19 }
 0x4e3   : > { %v1805_v30 = vsel %vm613_vm9, %v1804_v24, %v1687_v47  ;;  %v1816_v50 = vrot.slane %v1744_v48, 4  ;;  %v3417_v41 = vperm.slane %v1883_v34, %v2996_v19  ;;  %v1895_v9 = vsel %vm613_vm9, %v1894_v1, %v1875_v11 }
 0x4e4   : > { %v1811_v31 = vperm.slane %v1805_v30, %v2988_v8  ;;  %v1842_v32 = vrot.slane %v1815_v16, 4  ;;  %v1819_v33 = vsel %vm613_vm9, %v1744_v48, %v1818_v29  ;;  %v1901_v18 = vperm.slane %v1895_v9, %v2996_v19 }
 0x4e5   : > { %v1817_v21 = vsel %vm613_vm9, %v1816_v50, %v1706_v26  ;;  %v1827_v25 = vperm.slane %v1819_v33, %v2988_v8  ;;  %v1905_v60 = vperm.slane %v1897_v36, %v2996_v19  ;;  %v1912_v28 = vrot.slane %v1893_v59, 4 }
 0x4e6   : > { %v1830_v56 = vrot.slane %v1811_v31, 4  ;;  %v1823_v35 = vperm.slane %v1817_v21, %v2988_v8  ;;  %v1906_v54 = vrot.slane %v1901_v18, 4  ;;  %v1908_v50 = vrot.slane %v3417_v41, 4 }
 0x4e7   : > { %v1840_v37 = vrot.slane %v1827_v25, 4  ;;  %v1843_v39 = vsel %vm613_vm9, %v1827_v25, %v1842_v32  ;;  %v1910_v24 = vrot.slane %v1905_v60, 4  ;;  %v1913_v1 = vsel %vm613_vm9, %v1905_v60, %v1912_v28 }
 0x4e8   : > { %v1828_v4 = vrot.slane %v1823_v35, 4  ;;  %v1831_v42 = vsel %vm613_vm9, %v1823_v35, %v1830_v56  ;;  %v1851_v5 = vperm.slane %v1843_v39, %v2996_v19  ;;  %v1727_v40 = vpop.f32.mrf.mxu3  ;;  %v3434_v0 = vsel %vm613_vm9, %v1906_v54, %v3417_v41 }
 0x4e9   : > { %v1839_v43 = vperm.slane %v1831_v42, %v2996_v19  ;;  %v1841_v44 = vsel %vm613_vm9, %v1840_v37, %v1815_v16  ;;  %v1708_v46 = vpop.f32.mrf.mxu2  ;;  %v1911_v25 = vsel %vm613_vm9, %v1910_v24, %v1893_v59  ;;  %v1909_v41 = vsel %vm613_vm9, %v1901_v18, %v1908_v50  ;;  %v2612_v42 = vld [vmem:[%s2933_s26 + $0x8] sm:$0xff] }
 0x4ea   : > { %v1829_v47 = vsel %vm613_vm9, %v1828_v4, %v1811_v31  ;;  %v1847_v51 = vperm.slane %v1841_v44, %v2996_v19  ;;  %v1858_v53 = vrot.slane %v1851_v5, 4  ;;  %v1746_v52 = vpop.f32.mrf.mxu0  ;;  %2027 = vmatpush.bf16.msra.mxu1 %v2612_v42  ;;  %v2611_v5 = vld [vmem:[%s2933_s26] sm:$0xff]  ;;  %v2614_v50 = vld [vmem:[%s2938_s29 + $0x8] sm:$0xff] }
 0x4eb   : > { %v1835_v57 = vperm.slane %v1829_v47, %v2996_v19  ;;  %v1854_v58 = vrot.slane %v1839_v43, 4  ;;  %2114 = vmatpush.bf16.msra.mxu2 %v2614_v50 }
 0x4ec   : > { %v1856_v61 = vrot.slane %v1847_v51, 4  ;;  %v1859_v55 = vsel %vm613_vm9, 0.0, %v1858_v53  ;;  %v1925_v62 = vsel %vm613_vm9, %v1858_v53, %v1847_v51 }
 0x4ed   : > { %v1852_v2 = vrot.slane %v1835_v57, 4  ;;  %v1855_v22 = vsel %vm613_vm9, 0.0, %v1854_v58  ;;  %v1914_v3 = vsel %vm613_vm9, %v1854_v58, %v1835_v57  ;;  %v1929_v6 = vperm.slane %v1925_v62, %v2988_v8  ;;  %v3471_v62 = vld [vmem:[%s2948_s21] sm:$0xff] }
 0x4ee   : > { %v1857_v49 = vsel %vm613_vm9, 0.0, %v1856_v61  ;;  %v1919_v11 = vrot.slane %v1855_v22, 4  ;;  %v1930_v7 = vrot.slane %v1859_v55, 4  ;;  %v1918_v38 = vperm.slane %v1914_v3, %v2988_v8  ;;  %2028 = vmatpush.bf16.msra.mxu1 %v2611_v5 }
 0x4ef   : > { %v1950_v13 = vrot.slane %v1929_v6, 4  ;;  %v1853_v14 = vsel %vm613_vm9, 0.0, %v1852_v2  ;;  %v2005_v2 = vperm.slane %v3471_v62, 3 }
 0x4f0   : > { %v1931_v10 = vsel %vm613_vm9, %v1930_v7, %v1857_v49  ;;  %v1920_v17 = vsel %vm613_vm9, %v1919_v11, %v1853_v14  ;;  %v1938_v20 = vrot.slane %v1918_v38, 4 }
 0x4f1   : > { %v1935_v63 = vperm.slane %v1931_v10, %v2988_v8  ;;  %v1924_v26 = vperm.slane %v1920_v17, %v2988_v8 }
 0x4f3   : > { %v1939_v45 = vsel %vm613_vm9, %v1924_v26, %v1938_v20  ;;  %v1951_v29 = vsel %vm613_vm9, %v1935_v63, %v1950_v13  ;;  %v1936_v16 = vrot.slane %v1924_v26, 4  ;;  %v1948_v48 = vrot.slane %v1935_v63, 4 }
 0x4f4   : > { %v1947_v12 = vperm.slane %v1939_v45, %v2996_v19  ;;  %v1959_v30 = vperm.slane %v1951_v29, %v2996_v19 }
 0x4f5   : > { %v1937_v31 = vsel %vm613_vm9, %v1936_v16, %v1918_v38  ;;  %v1949_v32 = vsel %vm613_vm9, %v1948_v48, %v1929_v6  ;;  %v2773_v6 = vld [vmem:[#allocation2] sm:$0xff]  ;;  %v2774_v38 = vld [vmem:[#allocation2 + $0x8] sm:$0xff] }
 0x4f6   : > { %v1964_v33 = vrot.slane %v1959_v30, 4  ;;  %v1966_v8 = vrot.slane %v1947_v12, 4  ;;  %v1943_v34 = vperm.slane %v1937_v31, %v2996_v19  ;;  %v1955_v21 = vperm.slane %v1949_v32, %v2996_v19  ;;  %v2613_v31 = vld [vmem:[%s2938_s29] sm:$0xff] }
 0x4f7   : > { %2115 = vmatpush.bf16.msra.mxu2 %v2613_v31 }
 0x4f8   : > { %v1965_v56 = vsel %vm613_vm9, %v1964_v33, %v1947_v12  ;;  %v1967_v35 = vsel %vm613_vm9, %v1959_v30, %v1966_v8  ;;  %v1960_v23 = vrot.slane %v1955_v21, 4  ;;  %v1962_v36 = vrot.slane %v1943_v34, 4 }
 0x4f9   : > { %v2712_v37 = vpack.i.bf16 %v1965_v56, %v1911_v25  ;;  %v2717_v39 = vpack.i.bf16 %v1967_v35, %v1913_v1 }
 0x4fa   : > { %v1963_v9 = vsel %vm613_vm9, %v1955_v21, %v1962_v36  ;;  %v1961_v19 = vsel %vm613_vm9, %v1960_v23, %v1943_v34 }
 0x4fb   : > { %2713 = vrot.lane.b32.xlu1 %v2712_v37, %s2843_s24  ;;  %2718 = vrot.lane.b32.xlu2 %v2717_v39, %s2844_s25  ;;  %v2707_v4 = vpack.i.bf16 %v1963_v9, %v1909_v41 }
 0x4fd   : > { %2708 = vrot.lane.b32.xlu0 %v2707_v4, %s2845_s27 }
 0x555   : > { %v2719_v43 = vpop.permute.xlu2 %2718 }
 0x556   : > { %v2721_v53 = vunpack.i.h.bf16 %v2719_v43  ;;  %v2720_v52 = vunpack.i.l.bf16 %v2719_v43 }
 0x56d   : > { %v2714_v40 = vpop.permute.xlu1 %2713 }
 0x56e   : > { %v2716_v47 = vunpack.i.h.bf16 %v2714_v40  ;;  %v2715_v51 = vunpack.i.l.bf16 %v2714_v40  ;;  %v2084_v40 = vperm.slane %v3471_v62, 5 }
 0x56f   : > { %v2709_v44 = vpop.permute.xlu0 %2708 }
 0x570   : > { %v2711_v18 = vunpack.i.h.bf16 %v2709_v44  ;;  %v2710_v46 = vunpack.i.l.bf16 %v2709_v44 }
 0x572   : > { %v1992_v54 = vsel %vm1346_vm10, %v3434_v0, %v2710_v46  ;;  %v1993_v57 = vsel %vm1346_vm10, %v1961_v19, %v2711_v18  ;;  %v2081_v19 = vperm.slane %v3471_v62, 4 }
 0x573   : > { %v1995_v58 = vsel %vm1994_vm12, %v1992_v54, %v2715_v51  ;;  %v1996_v59 = vsel %vm1994_vm12, %v1993_v57, %v2716_v47  ;;  %v2621_v54 = vld [vmem:[%s2943_s12 + $0x30] sm:$0xff] }
 0x574   : > { %v1998_v60 = vsel %vm1997_vm13, %v1995_v58, %v2720_v52  ;;  %v1999_v61 = vsel %vm1997_vm13, %v1996_v59, %v2721_v53  ;;  %v2622_v53 = vld [vmem:[%s2943_s12 + $0x38] sm:$0xff]  ;;  %v2092_v52 = vperm.slane %v3471_v62, 6  ;;  %v2620_v59 = vld [vmem:[%s2943_s12 + $0x28] sm:$0xff] }
 0x575   : > { %v2000_v55 = vpack.c.bf16 %v1999_v61, %v1998_v60  ;;  %2228 = vmatpush.bf16.msra.mxu3 %v2622_v53 }
 0x577   : > { %2547 = vmatmul.msk.bf16.vlgmr.msra.gmra.mxu1 %vm499_vm1, %v2000_v55  ;;  %v2619_v55 = vld [vmem:[%s2943_s12 + $0x20] sm:$0xff] }
 0x579   : > { %2229 = vmatpush.bf16.msra.mxu3 %v2621_v54 }
 0x57d   : > { %2230 = vmatpush.bf16.msra.mxu3 %v2620_v59 }
 0x581   : > { %2231 = vmatpush.bf16.msra.mxu3 %v2619_v55 }
 0x5f4   : > { %v2030_v22 = vpop.f32.mrf.mxu1 }
 0x5f5   : > { %v2031_v3 = vadd.f32 %v2030_v22, %v2005_v2 }
 0x5f7   : > { %v3474_v49 = vadd.f32 %v2773_v6, %v2031_v3  ;;  %v2618_v3 = vld [vmem:[%s2943_s12 + $0x18] sm:$0xff] }
 0x5f8   : > { %2232 = vmatpush.bf16.msra.mxu3 %v2618_v3 }
 0x5f9   : > { %v2037_v0 = vsel %vm499_vm1, %v3474_v49, 0.0 }
 0x5fa   : > { %2038 = vadd.xlane.f32.xlu0 %v2037_v0  ;;  %v2617_v0 = vld [vmem:[%s2943_s12 + $0x10] sm:$0xff] }
 0x5fc   : > { %v2032_v11 = vpop.f32.mrf.mxu1  ;;  %2233 = vmatpush.bf16.msra.mxu3 %v2617_v0 }
 0x5fd   : > { %v2033_v7 = vadd.f32 %v2032_v11, %v2005_v2 }
 0x5ff   : > { %v3478_v13 = vadd.f32 %v2774_v38, %v2033_v7 }
 0x601   : > { %v2040_v14 = vsel %vm499_vm1, %v3478_v13, 0.0 }
 0x602   : > { %2041 = vadd.xlane.f32.xlu1 %v2040_v14  ;;  %v2616_v14 = vld [vmem:[%s2943_s12 + $0x8] sm:$0xff] }
 0x603   : > { %2234 = vmatpush.bf16.msra.mxu3 %v2616_v14 }
 0x66d   : > { %v2039_v10 = vpop.xlane.xlu0 %2038 }
 0x66e   : > { %v2043_v17 = vmul.f32 %v2039_v10, %v2962_v15  ;;  %v2615_v10 = vld [vmem:[%s2943_s12] sm:$0xff] }
 0x66f   : > { %2235 = vmatpush.bf16.msra.mxu3 %v2615_v10 }
 0x670   : > { %v2045_v20 = vsub.f32 %v3474_v49, %v2043_v17 }
 0x672   : > { %v2047_v63 = vmul.f32 %v2045_v20, %v2045_v20 }
 0x674   : > { %v2049_v26 = vsel %vm499_vm1, %v2047_v63, 0.0 }
 0x675   : > { %v2042_v24 = vpop.xlane.xlu1 %2041  ;;  %2050 = vadd.xlane.f32.xlu2 %v2049_v26 }
 0x676   : > { %v2044_v28 = vmul.f32 %v2042_v24, %v2962_v15 }
 0x678   : > { %v2046_v45 = vsub.f32 %v3478_v13, %v2044_v28 }
 0x67a   : > { %v2048_v29 = vmul.f32 %v2046_v45, %v2046_v45 }
 0x67c   : > { %v2052_v16 = vsel %vm499_vm1, %v2048_v29, 0.0 }
 0x67d   : > { %2053 = vadd.xlane.f32.xlu0 %v2052_v16 }
 0x6e8   : > { %v2051_v48 = vpop.xlane.xlu2 %2050 }
 0x6e9   : > { %v2055_v12 = vmul.f32 %v2051_v48, %v2962_v15 }
 0x6eb   : > { %v2057_v30 = vadd.f32 1e-05, %v2055_v12 }
 0x6ed   : > { %2760 = vrsqrt.f32 %v2057_v30  ;;  %vm2065_vm15 = vweird.f32 %v2057_v30 }
 0x6f0   : > { %v2054_v32 = vpop.xlane.xlu0 %2053 }
 0x6f1   : > { %v2056_v33 = vmul.f32 %v2054_v32, %v2962_v15 }
 0x6f3   : > { %v2761_v8 = vpop.eup %2760  ;;  %v2058_v34 = vadd.f32 1e-05, %v2056_v33 }
 0x6f4   : > { %v2060_v21 = vmul.f32 %v2761_v8, %v2057_v30  ;;  %vm2066_vm14 = vweird.f32 %v2761_v8 }
 0x6f5   : > { %2762 = vrsqrt.f32 %v2058_v34  ;;  %vm2067_vm0 = vmor %vm2065_vm15, %vm2066_vm14  ;;  %vm2075_vm3 = vweird.f32 %v2058_v34 }
 0x6f6   : > { %v2061_v25 = vmul.f32 %v2761_v8, %v2060_v21 }
 0x6f8   : > { %v2062_v1 = vmul.f32 0.5, %v2061_v25 }
 0x6fa   : > { %v2063_v56 = vsub.f32 1.5, %v2062_v1 }
 0x6fb   : > { %v2763_v35 = vpop.eup %2762 }
 0x6fc   : > { %v2064_v23 = vmul.f32 %v2761_v8, %v2063_v56  ;;  %v2070_v36 = vmul.f32 %v2763_v35, %v2058_v34  ;;  %vm2076_vm2 = vweird.f32 %v2763_v35 }
 0x6fd   : > { %vm2077_vm4 = vmor %vm2075_vm3, %vm2076_vm2 }
 0x6fe   : > { %v2071_v37 = vmul.f32 %v2763_v35, %v2070_v36  ;;  %v2068_v39 = vsel %vm2067_vm0, %v2761_v8, %v2064_v23 }
 0x6ff   : > { %v2079_v4 = vmul.f32 %v2068_v39, %v2045_v20 }
 0x700   : > { %v2072_v41 = vmul.f32 0.5, %v2071_v37  ;;  %v2179_v37 = vperm.slane %v3471_v62, 7 }
 0x701   : > { %v2082_v43 = vmul.f32 %v2081_v19, %v2079_v4 }
 0x702   : > { %v2073_v9 = vsub.f32 1.5, %v2072_v41 }
 0x703   : > { %v2085_v46 = vadd.f32 %v2084_v40, %v2082_v43 }
 0x704   : > { %v2074_v42 = vmul.f32 %v2763_v35, %v2073_v9 }
 0x706   : > { %v2078_v5 = vsel %vm2077_vm4, %v2763_v35, %v2074_v42 }
 0x707   : > { %v2080_v44 = vmul.f32 %v2078_v5, %v2046_v45 }
 0x709   : > { %v2083_v18 = vmul.f32 %v2081_v19, %v2080_v44 }
 0x70b   : > { %v2086_v47 = vadd.f32 %v2084_v40, %v2083_v18 }
 0x70d   : > { %v2087_v51 = vpack.c.bf16 %v2086_v47, %v2085_v46 }
 0x70f   : > { %2556 = vmatmul.msk.bf16.vlgmr.msra.gmra.mxu2 %vm499_vm1, %v2087_v51 }
 0x792   : > { %v2117_v57 = vpop.f32.mrf.mxu2 }
 0x793   : > { %v2118_v58 = vadd.f32 %v2117_v57, %v2092_v52 }
 0x795   : > { %v2122_v60 = vmul.f32 -1.702, %v2118_v58 }
 0x797   : > { %v2124_v61 = vmul.f32 1.442695, %v2122_v60 }
 0x799   : > { %2764 = vpow2.f32 %v2124_v61 }
 0x79a   : > { %v2119_v2 = vpop.f32.mrf.mxu2 }
 0x79b   : > { %v2120_v22 = vadd.f32 %v2119_v2, %v2092_v52 }
 0x79d   : > { %v2123_v6 = vmul.f32 -1.702, %v2120_v22 }
 0x79f   : > { %v2765_v11 = vpop.eup %2764  ;;  %v2126_v7 = vmul.f32 1.442695, %v2123_v6 }
 0x7a0   : > { %v2128_v38 = vadd.f32 1.0, %v2765_v11 }
 0x7a1   : > { %2766 = vpow2.f32 %v2126_v7 }
 0x7a2   : > { %2768 = vrcp.f32 %v2128_v38  ;;  %v2141_v48 = vand.u32 2147483648, %v2128_v38  ;;  %vm2135_vm6 = vweird.f32 %v2128_v38  ;;  %v2139_v12 = vand.u32 2147483647, %v2128_v38 }
 0x7a4   : > { %v2142_v8 = vor.u32 1.1754944e-38, %v2141_v48  ;;  %vm2140_vm9 = vcmp.eq.f32.partialorder %v2139_v12, 8.507059e+37 }
 0x7a7   : > { %v2767_v17 = vpop.eup %2766 }
 0x7a8   : > { %v2769_v20 = vpop.eup %2768  ;;  %v2129_v63 = vadd.f32 1.0, %v2767_v17 }
 0x7a9   : > { %v2131_v26 = vmul.f32 %v2769_v20, %v2128_v38  ;;  %vm2136_vm5 = vweird.f32 %v2769_v20 }
 0x7aa   : > { %2770 = vrcp.f32 %v2129_v63  ;;  %vm2137_vm7 = vmor %vm2135_vm6, %vm2136_vm5  ;;  %v2156_v50 = vand.u32 2147483648, %v2129_v63  ;;  %v2154_v33 = vand.u32 2147483647, %v2129_v63  ;;  %vm2150_vm10 = vweird.f32 %v2129_v63 }
 0x7ab   : > { %v2132_v24 = vsub.f32 1.0, %v2131_v26 }
 0x7ac   : > { %v2157_v25 = vor.u32 1.1754944e-38, %v2156_v50  ;;  %vm2155_vm13 = vcmp.eq.f32.partialorder %v2154_v33, 8.507059e+37 }
 0x7ad   : > { %v2133_v28 = vmul.f32 %v2769_v20, %v2132_v24 }
 0x7af   : > { %v2134_v29 = vadd.f32 %v2769_v20, %v2133_v28 }
 0x7b0   : > { %v2771_v45 = vpop.eup %2770 }
 0x7b1   : > { %v2146_v16 = vmul.f32 %v2771_v45, %v2129_v63  ;;  %v2138_v31 = vsel %vm2137_vm7, %v2769_v20, %v2134_v29  ;;  %vm2151_vm8 = vweird.f32 %v2771_v45 }
 0x7b2   : > { %v2143_v21 = vsel %vm2140_vm9, %v2142_v8, %v2138_v31  ;;  %vm2152_vm11 = vmor %vm2150_vm10, %vm2151_vm8 }
 0x7b3   : > { %v2147_v30 = vsub.f32 1.0, %v2146_v16  ;;  %v2160_v35 = vmul.f32 %v2143_v21, %v2118_v58 }
 0x7b5   : > { %v2148_v32 = vmul.f32 %v2771_v45, %v2147_v30 }
 0x7b7   : > { %v2149_v34 = vadd.f32 %v2771_v45, %v2148_v32 }
 0x7b9   : > { %v2153_v1 = vsel %vm2152_vm11, %v2771_v45, %v2149_v34 }
 0x7ba   : > { %v2158_v56 = vsel %vm2155_vm13, %v2157_v25, %v2153_v1 }
 0x7bb   : > { %v2161_v23 = vmul.f32 %v2158_v56, %v2120_v22 }
 0x7bd   : > { %v2162_v36 = vpack.c.bf16 %v2161_v23, %v2160_v35 }
 0x7bf   : > { %2236 = vmatmul.bf16.vlgmr.msra.gmra.mxu3 %v2162_v36 }
 0x842   : > { %v2237_v39 = vpop.f32.mrf.mxu3 }
 0x843   : > { %v2238_v41 = vadd.f32 %v2237_v39, %v2179_v37 }
 0x845   : > { %v2242_v9 = vadd.f32 %v2238_v41, %v3474_v49 }
 0x847   : > { %2244 = vst.msk [vmem:[#allocation2] sm:$0xff] %vm499_vm1, %v2242_v9 }
 0x84a   : > { %v2239_v19 = vpop.f32.mrf.mxu3 }
 0x84b   : > { %v2240_v4 = vadd.f32 %v2239_v19, %v2179_v37  ;;  %2249 = sbr.rel (%p2589_p6) target bundleno = 2667 (0xa6b), region = 68 }
 0x84d   : > { %v2243_v42 = vadd.f32 %v2240_v4, %v3478_v13 }
 0x84f   : > { %2245 = vst.msk [vmem:[#allocation2 + $0x8] sm:$0xff] %vm499_vm1, %v2243_v42 }
 0x850   : > { %v2253_v5 = vsel %vm499_vm1, %v2243_v42, 0.0  ;;  %v2250_v62 = vsel %vm499_vm1, %v2242_v9, 0.0  ;;  %v2624_v58 = vld [vmem:[%s3554_s9 + $0x8] sm:$0xff]  ;;  %v2294_v38 = vperm.slane %v2970_v27, 0  ;;  %v2300_v12 = vld [vmem:[%s3548_s3] sm:$0x3] }
 0x851   : > { %2254 = vadd.xlane.f32.xlu0 %v2253_v5  ;;  %2350 = vmatpush.bf16.msra.mxu1 %v2624_v58 }
 0x859   : > { %2251 = vadd.xlane.f32.xlu0 %v2250_v62 }
 0x8c4   : > { %v2255_v40 = vpop.xlane.xlu0 %2254 }
 0x8c5   : > { %v2257_v49 = vmul.f32 %v2255_v40, %v2962_v15 }
 0x8c7   : > { %v2259_v43 = vsub.f32 %v2243_v42, %v2257_v49 }
 0x8c9   : > { %v2261_v44 = vmul.f32 %v2259_v43, %v2259_v43 }
 0x8cb   : > { %v2265_v18 = vsel %vm499_vm1, %v2261_v44, 0.0 }
 0x8cc   : > { %2266 = vadd.xlane.f32.xlu1 %v2265_v18  ;;  %v2252_v13 = vpop.xlane.xlu0 %2251 }
 0x8cd   : > { %v2256_v46 = vmul.f32 %v2252_v13, %v2962_v15 }
 0x8cf   : > { %v2258_v47 = vsub.f32 %v2242_v9, %v2256_v46 }
 0x8d1   : > { %v2260_v51 = vmul.f32 %v2258_v47, %v2258_v47 }
 0x8d3   : > { %v2262_v53 = vsel %vm499_vm1, %v2260_v51, 0.0 }
 0x8d4   : > { %2263 = vadd.xlane.f32.xlu1 %v2262_v53 }
 0x93f   : > { %v2267_v52 = vpop.xlane.xlu1 %2266 }
 0x940   : > { %v2269_v54 = vmul.f32 %v2267_v52, %v2962_v15 }
 0x942   : > { %v2271_v57 = vadd.f32 1e-05, %v2269_v54 }
 0x944   : > { %2775 = vrsqrt.f32 %v2271_v57  ;;  %vm2288_vm15 = vweird.f32 %v2271_v57 }
 0x947   : > { %v2264_v59 = vpop.xlane.xlu1 %2263 }
 0x948   : > { %v2268_v60 = vmul.f32 %v2264_v59, %v2962_v15  ;;  %v2297_v15 = vperm.slane %v2970_v27, 1  ;;  %v2623_v27 = vld [vmem:[%s3554_s9] sm:$0xff] }
 0x949   : > { %2351 = vmatpush.bf16.msra.mxu1 %v2623_v27 }
 0x94a   : > { %v2776_v61 = vpop.eup %2775  ;;  %v2270_v55 = vadd.f32 1e-05, %v2268_v60 }
 0x94b   : > { %v2283_v2 = vmul.f32 %v2776_v61, %v2271_v57  ;;  %vm2289_vm14 = vweird.f32 %v2776_v61 }
 0x94c   : > { %2777 = vrsqrt.f32 %v2270_v55  ;;  %vm2290_vm0 = vmor %vm2288_vm15, %vm2289_vm14  ;;  %vm2278_vm3 = vweird.f32 %v2270_v55 }
 0x94d   : > { %v2284_v22 = vmul.f32 %v2776_v61, %v2283_v2 }
 0x94f   : > { %v2285_v3 = vmul.f32 0.5, %v2284_v22 }
 0x951   : > { %v2286_v6 = vsub.f32 1.5, %v2285_v3 }
 0x952   : > { %v2778_v0 = vpop.eup %2777 }
 0x953   : > { %v2273_v11 = vmul.f32 %v2778_v0, %v2270_v55  ;;  %v2287_v7 = vmul.f32 %v2776_v61, %v2286_v6  ;;  %vm2279_vm2 = vweird.f32 %v2778_v0 }
 0x954   : > { %vm2280_vm4 = vmor %vm2278_vm3, %vm2279_vm2 }
 0x955   : > { %v2274_v14 = vmul.f32 %v2778_v0, %v2273_v11  ;;  %v2291_v10 = vsel %vm2290_vm0, %v2776_v61, %v2287_v7 }
 0x956   : > { %v2293_v17 = vmul.f32 %v2291_v10, %v2259_v43 }
 0x957   : > { %v2275_v20 = vmul.f32 0.5, %v2274_v14 }
 0x958   : > { %v2296_v63 = vmul.f32 %v2294_v38, %v2293_v17 }
 0x959   : > { %v2276_v26 = vsub.f32 1.5, %v2275_v20 }
 0x95a   : > { %v2299_v24 = vadd.f32 %v2297_v15, %v2296_v63 }
 0x95b   : > { %v2277_v28 = vmul.f32 %v2778_v0, %v2276_v26 }
 0x95c   : > { %2318 = vmatpush.msra.mxu0 %v2299_v24 }
 0x95d   : > { %v2281_v45 = vsel %vm2280_vm4, %v2778_v0, %v2277_v28 }
 0x95e   : > { %v2292_v29 = vmul.f32 %v2281_v45, %v2258_v47 }
 0x960   : > { %v2295_v16 = vmul.f32 %v2294_v38, %v2292_v29 }
 0x962   : > { %v2298_v48 = vadd.f32 %v2297_v15, %v2295_v16 }
 0x964   : > { %2319 = vmatpush.msra.mxu0 %v2298_v48 }
 0x965   : > { %2590 = vmatmul.msk.f32.vlgmr.msra.gmra.mxu0 %vm1994_vm12, %v2300_v12 }
 0x9e2   : > { %v2321_v30 = vpop.f32.mrf.mxu0 }
 0x9e3   : > { %v2324_v50 = vpack.c.bf16 %v2321_v30, %v2321_v30 }
 0x9e5   : > { %2599 = vmatmul.msk.bf16.vlgmr.msra.gmra.mxu1 %vm499_vm1, %v2324_v50 }
 0xa62   : > { %v2353_v31 = vpop.f32.mrf.mxu1 }
 0xa63   : > { %2357 = vst [vmem:[#allocation3] sm:$0x3] %v2353_v31 }
 0xa6a   : > { %v2355_v32 = vpop.f32.mrf.mxu1 }
 0xa6b PF: > { %s3556_s20 = sadd.s32 4294967295, %s2833_s15   ;;  %s2368_s23 = sshll.u32 %s3555_s10, 4  ;;  %s2369_s23 = int_to_ptr.hbm [resolvable:$true] %s2368_s23 }
 0xa6c   : > { %p2629_p7 = scmp.eq.s32.totalorder %s3556_s20, 1  ;;  %s2846_s30 = smov [#allocation3]  }
 0xa6d   : > { %s2366_s11 = sshll.u32 %s2846_s30, 4  ;;  %s2367_s11 = int_to_ptr.vmem [resolvable:$true] %s2366_s11 }
 0xa6e   : > { %2626 = dma.vmem_to_hbm [thread:$0]  (%p2629_p7), %s2367_s11, 32, %s2369_s23, [#allocation4]  }
 0xa6f   : > { %2820 = dma.done.wait (%p2629_p7), [#allocation4], 32  }
 0xa70   : > { %2822 = vsyncadd (%p2629_p7), [#allocation4], 4294967264 }
 0xa71 PF: > { %s21_s15 = sadd.s32 1, %s2833_s15   ;;  %s3557_s13 = smov %s2829_s14 }
 0xa72   : > { %p18_p8 = scmp.ge.s32.totalorder %s21_s15, 4   ;;  %s3558_s14 = smov %s3560_s17 }
 0xa74   :  { %20 = sbr.rel (!%p18_p8) target bundleno = 2 (0x2), region = 114 }
 0xa79   :  { %2382 = vsyncpa [#allocation4], 1 }
 0xa7a   :  { %2384 = vsyncpa [#allocation4 + $0x1], 1 }

</bundles_post_ra>
